<compile_context>
chip_gen: v5e
topology: v5e:2x2
jax: 0.10.0
libtpu: 0.0.40
codegen_flags: <defaults>
</compile_context>

<pallas_src>
import functools

import jax
import jax.numpy as jnp
from jax import lax
from jax.experimental import pallas as pl
from jax.experimental.pallas import tpu as pltpu


# --------------------------------------------------------------------------- #
# Fused kernel.  Grid = (phase, image):
#   phase 0: conv3x3(upsampled x)+bias+ReLU, stash y in VMEM, accumulate BN stats
#   phase 1: BN normalize + affine from the stashed y, skip*(1-index), channel concat
# --------------------------------------------------------------------------- #
def _unet_up_kernel(xv_ref, w_ref, b_ref, gamma_ref, beta_ref, cmask_ref,
                    skip_ref, keep_ref, out_ref, sum_ref, ssq_ref, ystash_ref=None,
                    *, c_out, w2, p_len, inv_count, eps, use_stash):
    phase = pl.program_id(0)
    img = pl.program_id(1)

    # ---- 3x3 conv on the 2x-upsampled input, as 9 shifted matmuls ---------- #
    # xv_ref is (Cin_p, Lv): the upsampled image, zero-padded by one row on top /
    # bottom, rows flattened onto the lane axis, plus one leading & trailing zero.
    # Tap (ky, kx) of output position (h, w) lives at flat offset ky*W2 + kx from
    # that position; the two horizontally-wrapping tap groups (kx=0, kx=2) are
    # zeroed at the left / right image columns via cmask.
    def conv_relu():
        xv = xv_ref[...].astype(jnp.float32)            # bf16 HBM stream -> f32 once
        acc = jnp.zeros((c_out, p_len), jnp.float32)
        for kx in range(3):
            part = jnp.zeros((c_out, p_len), jnp.float32)
            for ky in range(3):
                t = 3 * ky + kx                          # weight tap index
                s = ky * w2 + kx                         # static lane shift
                part = part + jnp.dot(w_ref[t], xv[:, s:s + p_len],
                                      preferred_element_type=jnp.float32)
            if kx == 0:
                part = part * cmask_ref[0:1, :]          # zero the w == 0 wrap-around
            elif kx == 2:
                part = part * cmask_ref[1:2, :]          # zero the w == W2-1 wrap-around
            acc = acc + part
        return jnp.maximum(acc + b_ref[...], 0.0)        # (Cout, P): conv + bias + ReLU

    def accumulate_stats(y):
        sum_ref[...] += jnp.sum(y, axis=1, keepdims=True)
        ssq_ref[...] += jnp.sum(y * y, axis=1, keepdims=True)

    def normalize_and_concat(y):
        mean = sum_ref[...] * inv_count                  # (Cout, 1)
        # Biased variance (PyTorch training-mode BN).  E[y^2]-mean^2 is fine at this
        # scale / eps=0.8; switch to a Welford-style combine if N*P grows a lot.
        var = ssq_ref[...] * inv_count - mean * mean
        inv_std = lax.rsqrt(var + eps)
        scale = gamma_ref[...] * inv_std
        shift = beta_ref[...] - mean * scale
        # NOTE: these two stores are sublane-aligned (dense vst) when Cout % 8 == 0;
        # other channel counts still work but become masked partial stores (perf only).
        out_ref[:c_out, :] = y * scale + shift                           # (Cout, P)
        out_ref[c_out:, :] = (skip_ref[...].astype(jnp.float32) *
                              keep_ref[...].astype(jnp.float32))         # (Cskip, P)

    @pl.when(jnp.logical_and(phase == 0, img == 0))
    def _init_stats():
        sum_ref[...] = jnp.zeros_like(sum_ref)
        ssq_ref[...] = jnp.zeros_like(ssq_ref)

    if use_stash:
        @pl.when(phase == 0)
        def _phase0():
            y = conv_relu()
            ystash_ref[img] = y                          # keep activation in VMEM
            accumulate_stats(y)

        @pl.when(phase == 1)
        def _phase1():
            normalize_and_concat(ystash_ref[img])        # no recompute, no xv DMA
    else:
        y = conv_relu()                                  # fallback: recompute in phase 1

        @pl.when(phase == 0)
        def _phase0():
            accumulate_stats(y)

        @pl.when(phase == 1)
        def _phase1():
            normalize_and_concat(y)


# --------------------------------------------------------------------------- #
# Wrapper: cheap layout prep (one fused XLA producer per stream) + the fused call.
# --------------------------------------------------------------------------- #
def unet_up_forward(x, skip, index, w, b, gamma, beta, *, eps=0.8):
    """x: (N,Cin,H,W), skip: (N,Cskip,2H,2W), index: (N,1,8,8)  (NCHW, f32)."""
    N, Cin, H, W = x.shape
    Ns, Cskip, H2, W2 = skip.shape
    Cout = w.shape[0]
    assert Ns == N and H2 == 2 * H and W2 == 2 * W
    assert H2 % 8 == 0 and W2 % 8 == 0
    P = H2 * W2
    Cin_p = ((Cin + 7) // 8) * 8                 # pad channels to a sublane multiple
    Lv = (H2 + 2) * W2 + 2                       # vert-padded rows flattened + lead/tail zero

    # bf16 activation stream: nearest 2x upsample, channel pad, vertical zero pad,
    # rows flattened onto lanes, +1 leading/trailing zero.  Built in one XLA fusion.
    xb = x.astype(jnp.bfloat16)
    xu = jnp.repeat(jnp.repeat(xb, 2, axis=2), 2, axis=3)                   # (N,Cin,H2,W2)
    xu = jnp.pad(xu, ((0, 0), (0, Cin_p - Cin), (1, 1), (0, 0)))            # (N,Cin_p,H2+2,W2)
    xv = jnp.pad(xu.reshape(N, Cin_p, (H2 + 2) * W2), ((0, 0), (0, 0), (1, 1)))  # (N,Cin_p,Lv)

    # weights: (Cout,Cin,3,3) -> (9, Cout, Cin_p) f32, tap t = 3*ky + kx (tiny, VMEM-resident)
    w_t = jnp.transpose(w, (2, 3, 0, 1)).reshape(9, Cout, Cin)
    w_t = jnp.pad(w_t, ((0, 0), (0, 0), (0, Cin_p - Cin))).astype(jnp.float32)
    b2 = b.reshape(Cout, 1).astype(jnp.float32)
    gamma2 = gamma.reshape(Cout, 1).astype(jnp.float32)
    beta2 = beta.reshape(Cout, 1).astype(jnp.float32)

    # column masks for the horizontally-wrapping tap groups (compile-time constants)
    col = jnp.arange(P, dtype=jnp.int32) % W2
    cmask = jnp.stack([(col != 0), (col != W2 - 1)]).astype(jnp.float32)    # (2, P)

    # skip and (1 - tiled index) in the same per-image (channels, P) layout, bf16 streams
    skip_flat = skip.reshape(N, Cskip, P).astype(jnp.bfloat16)
    keep_flat = (1.0 - jnp.tile(index, (1, 1, H2 // 8, W2 // 8))
                 ).reshape(N, 1, P).astype(jnp.bfloat16)

    # y-stash gate: keep every image's ReLU'd conv activation in VMEM if it fits.
    stash_bytes = N * Cout * P * 4
    use_stash = stash_bytes <= (16 << 20)

    # With the stash, xv is only needed in phase 0: park its block during phase 1 so the
    # index never changes after the last phase-0 step and no DMA is issued.
    if use_stash:
        xv_map = lambda p, n: ((1 - p) * n + p * (N - 1), 0, 0)
    else:
        xv_map = lambda p, n: (n, 0, 0)

    scratch = [pltpu.VMEM((Cout, 1), jnp.float32),        # BN sum
               pltpu.VMEM((Cout, 1), jnp.float32)]        # BN sum of squares
    if use_stash:
        scratch.append(pltpu.VMEM((N, Cout, P), jnp.float32))   # y-stash

    # Explicit VMEM limit sized to the working set (default scoped limits are 16/32 MiB,
    # well below physical 128 MiB on v5e/v6e and 64 MiB on v7x).
    est = (2 * (Cin_p * Lv * 2 + Cskip * P * 2 + P * 2 + (Cout + Cskip) * P * 4)
           + 9 * Cout * Cin_p * 4 + 3 * Cout * 4 + 2 * P * 4
           + (stash_bytes if use_stash else 0) + (8 << 20))
    vmem_limit = int(min(max(est, 32 << 20), 48 << 20))

    kern = functools.partial(_unet_up_kernel, c_out=Cout, w2=W2, p_len=P,
                             inv_count=1.0 / float(N * P), eps=float(eps),
                             use_stash=use_stash)

    out_flat = pl.pallas_call(
        kern,
        out_shape=jax.ShapeDtypeStruct((N, Cout + Cskip, P), jnp.float32),
        grid_spec=pltpu.PrefetchScalarGridSpec(
            num_scalar_prefetch=0,
            grid=(2, N),                                   # (phase, image)
            in_specs=[
                pl.BlockSpec((None, Cin_p, Lv), xv_map),                       # xv (bf16)
                pl.BlockSpec((9, Cout, Cin_p), lambda p, n: (0, 0, 0)),        # weights
                pl.BlockSpec((Cout, 1), lambda p, n: (0, 0)),                  # bias
                pl.BlockSpec((Cout, 1), lambda p, n: (0, 0)),                  # gamma
                pl.BlockSpec((Cout, 1), lambda p, n: (0, 0)),                  # beta
                pl.BlockSpec((2, P), lambda p, n: (0, 0)),                     # col masks
                pl.BlockSpec((None, Cskip, P), lambda p, n: (p * n, 0, 0)),    # skip (bf16)
                pl.BlockSpec((None, 1, P), lambda p, n: (p * n, 0, 0)),        # 1-index (bf16)
            ],
            # Output block stays parked on image 0 during the stats phase; its index only
            # changes after phase-1/image-0 has written it, so there is no garbage
            # writeback and no wasted bandwidth.  It walks the images during phase 1.
            out_specs=pl.BlockSpec((None, Cout + Cskip, P),
                                   lambda p, n: (p * n, 0, 0)),
            scratch_shapes=scratch,
        ),
        compiler_params=pltpu.CompilerParams(
            dimension_semantics=("arbitrary", "arbitrary"),
            vmem_limit_bytes=vmem_limit),
    )(xv, w_t, b2, gamma2, beta2, cmask, skip_flat, keep_flat)

    # already NCHW-flat: just a free reshape, no transpose pass through HBM
    return out_flat.reshape(N, Cout + Cskip, H2, W2)


# --------------------------------------------------------------------------- #
# Pure-JAX reference (mirrors the PyTorch forward) for a sanity check
# --------------------------------------------------------------------------- #
def reference_forward(x, skip, index, w, b, gamma, beta, eps=0.8):
    xu = jnp.repeat(jnp.repeat(x, 2, axis=2), 2, axis=3)
    y = lax.conv_general_dilated(xu, w, (1, 1), ((1, 1), (1, 1)),
                                 dimension_numbers=('NCHW', 'OIHW', 'NCHW'))
    y = y + b[None, :, None, None]
    y = jnp.maximum(y, 0.0)
    mean = jnp.mean(y, axis=(0, 2, 3), keepdims=True)
    var = jnp.mean(jnp.square(y - mean), axis=(0, 2, 3), keepdims=True)
    y = (y - mean) / jnp.sqrt(var + eps)
    y = y * gamma[None, :, None, None] + beta[None, :, None, None]
    _, Cs, H2, W2 = skip.shape
    idx = jnp.tile(index, (1, Cs, H2 // 8, W2 // 8))
    return jnp.concatenate([y, skip * (1.0 - idx)], axis=1)


if __name__ == "__main__":
    key = jax.random.PRNGKey(0)
    ks = jax.random.split(key, 7)

    N, Cin, H, W = 2, 4, 16, 16       # x: (N, in_size, H, W)
    Cout = 8                          # out_size
    Cskip = 8                         # skip_input channels
    H2, W2 = 2 * H, 2 * W

    x = jax.random.normal(ks[0], (N, Cin, H, W), jnp.float32)
    skip = jax.random.normal(ks[1], (N, Cskip, H2, W2), jnp.float32)
    index = jax.random.bernoulli(ks[2], 0.5, (N, 1, 8, 8)).astype(jnp.float32)

    w = 0.1 * jax.random.normal(ks[3], (Cout, Cin, 3, 3), jnp.float32)
    b = 0.1 * jax.random.normal(ks[4], (Cout,), jnp.float32)
    gamma = 1.0 + 0.1 * jax.random.normal(ks[5], (Cout,), jnp.float32)
    beta = 0.1 * jax.random.normal(ks[6], (Cout,), jnp.float32)

    fwd = jax.jit(unet_up_forward)
    out = jax.block_until_ready(fwd(x, skip, index, w, b, gamma, beta))

    ref = reference_forward(x, skip, index, w, b, gamma, beta)
    assert out.shape == (N, Cout + Cskip, H2, W2), out.shape
    err = float(jnp.max(jnp.abs(out - ref)))
    assert jnp.allclose(out, ref, rtol=1e-2, atol=1e-2), err
    print("KERNEL_OK")
</pallas_src>

<mosaic_0001>
module attributes {stable_mosaic.version = 11 : i64} {
  func.func @_unet_up_kernel(%arg0: i32, %arg1: i32, %arg2: memref<1x8x1090xbf16, #tpu.memory_space<vmem>>, %arg3: memref<9x8x8xf32, #tpu.memory_space<vmem>>, %arg4: memref<8x1xf32, #tpu.memory_space<vmem>>, %arg5: memref<8x1xf32, #tpu.memory_space<vmem>>, %arg6: memref<8x1xf32, #tpu.memory_space<vmem>>, %arg7: memref<2x1024xf32, #tpu.memory_space<vmem>>, %arg8: memref<1x8x1024xbf16, #tpu.memory_space<vmem>>, %arg9: memref<1x1x1024xbf16, #tpu.memory_space<vmem>>, %arg10: memref<1x16x1024xf32, #tpu.memory_space<vmem>>, %arg11: memref<8x1xf32, #tpu.memory_space<vmem>>, %arg12: memref<8x1xf32, #tpu.memory_space<vmem>>, %arg13: memref<2x8x1024xf32, #tpu.memory_space<vmem>>) attributes {dimension_semantics = [#tpu.dimension_semantics<arbitrary>, #tpu.dimension_semantics<arbitrary>], iteration_bounds = array<i64: 2, 2>, scalar_prefetch = 0 : i64, scratch_operands = 3 : i64, tpu.core_type = #tpu.core_type<tc>, window_params = [{transform_indices = @transform_0, window_bounds = array<i64: 1, 8, 1090>}, {pipeline_mode = #tpu.pipeline_mode<synchronous>, transform_indices = @transform_1, window_bounds = array<i64: 9, 8, 8>}, {pipeline_mode = #tpu.pipeline_mode<synchronous>, transform_indices = @transform_2, window_bounds = array<i64: 8, 1>}, {pipeline_mode = #tpu.pipeline_mode<synchronous>, transform_indices = @transform_3, window_bounds = array<i64: 8, 1>}, {pipeline_mode = #tpu.pipeline_mode<synchronous>, transform_indices = @transform_4, window_bounds = array<i64: 8, 1>}, {pipeline_mode = #tpu.pipeline_mode<synchronous>, transform_indices = @transform_5, window_bounds = array<i64: 2, 1024>}, {transform_indices = @transform_6, window_bounds = array<i64: 1, 8, 1024>}, {transform_indices = @transform_7, window_bounds = array<i64: 1, 1, 1024>}, {transform_indices = @transform_8, window_bounds = array<i64: 1, 16, 1024>}]} {
    %c0_i32 = arith.constant 0 : i32
    %0 = arith.cmpi eq, %arg0, %c0_i32 : i32
    %c0_i32_0 = arith.constant 0 : i32
    %1 = arith.cmpi eq, %arg1, %c0_i32_0 : i32
    %2 = arith.andi %0, %1 : i1
    %3 = arith.extui %2 : i1 to i32
    %c0_i32_1 = arith.constant 0 : i32
    %4 = arith.cmpi ne, %3, %c0_i32_1 : i32
    scf.if %4 {
      %cst = arith.constant 0.000000e+00 : f32
      %11 = vector.broadcast %cst : f32 to vector<8x1xf32>
      %c0 = arith.constant 0 : index
      %c0_5 = arith.constant 0 : index
      %12 = vector.load %arg11[%c0, %c0_5] : memref<8x1xf32, #tpu.memory_space<vmem>>, vector<8x1xf32>
      tpu.vector_store %arg11[%c0, %c0_5], %11 {strides = array<i32>} : memref<8x1xf32, #tpu.memory_space<vmem>>, vector<8x1xf32>,
      %cst_6 = arith.constant 0.000000e+00 : f32
      %13 = vector.broadcast %cst_6 : f32 to vector<8x1xf32>
      %c0_7 = arith.constant 0 : index
      %c0_8 = arith.constant 0 : index
      %14 = vector.load %arg12[%c0_7, %c0_8] : memref<8x1xf32, #tpu.memory_space<vmem>>, vector<8x1xf32>
      tpu.vector_store %arg12[%c0_7, %c0_8], %13 {strides = array<i32>} : memref<8x1xf32, #tpu.memory_space<vmem>>, vector<8x1xf32>,
    } else {
    }
    %c0_i32_2 = arith.constant 0 : i32
    %5 = arith.cmpi eq, %arg0, %c0_i32_2 : i32
    %6 = arith.extui %5 : i1 to i32
    %c0_i32_3 = arith.constant 0 : i32
    %7 = arith.cmpi ne, %6, %c0_i32_3 : i32
    scf.if %7 {
      %c0 = arith.constant 0 : index
      %c0_5 = arith.constant 0 : index
      %c0_6 = arith.constant 0 : index
      %11 = vector.load %arg2[%c0, %c0_5, %c0_6] : memref<1x8x1090xbf16, #tpu.memory_space<vmem>>, vector<1x8x1090xbf16>
      %12 = vector.shape_cast %11 : vector<1x8x1090xbf16> to vector<8x1090xbf16>
      %13 = arith.extf %12 : vector<8x1090xbf16> to vector<8x1090xf32>
      %cst = arith.constant 0.000000e+00 : f32
      %14 = vector.broadcast %cst : f32 to vector<8x1024xf32>
      %cst_7 = arith.constant 0.000000e+00 : f32
      %15 = vector.broadcast %cst_7 : f32 to vector<8x1024xf32>
      %c0_8 = arith.constant 0 : index
      %c0_9 = arith.constant 0 : index
      %c0_10 = arith.constant 0 : index
      %16 = vector.load %arg3[%c0_8, %c0_9, %c0_10] : memref<9x8x8xf32, #tpu.memory_space<vmem>>, vector<1x8x8xf32>
      %17 = vector.shape_cast %16 : vector<1x8x8xf32> to vector<8x8xf32>
      %18 = vector.extract_strided_slice %13 {offsets = [0, 0], sizes = [8, 1024], strides = [1, 1]} : vector<8x1090xf32> to vector<8x1024xf32>
      %cst_11 = arith.constant dense<0.000000e+00> : vector<8x1024xf32>
      %19 = tpu.matmul %17, %18, %cst_11 {dimension_numbers = #tpu.dot_dimension_numbers<[1], [0], [0], [1], [0, 0, 1, 1], [], []>} : vector<8x8xf32>, vector<8x1024xf32>, vector<8x1024xf32> -> vector<8x1024xf32>
      %20 = arith.addf %15, %19 : vector<8x1024xf32>
      %c3 = arith.constant 3 : index
      %c0_12 = arith.constant 0 : index
      %c0_13 = arith.constant 0 : index
      %21 = vector.load %arg3[%c3, %c0_12, %c0_13] : memref<9x8x8xf32, #tpu.memory_space<vmem>>, vector<1x8x8xf32>
      %22 = vector.shape_cast %21 : vector<1x8x8xf32> to vector<8x8xf32>
      %23 = vector.extract_strided_slice %13 {offsets = [0, 32], sizes = [8, 1024], strides = [1, 1]} : vector<8x1090xf32> to vector<8x1024xf32>
      %cst_14 = arith.constant dense<0.000000e+00> : vector<8x1024xf32>
      %24 = tpu.matmul %22, %23, %cst_14 {dimension_numbers = #tpu.dot_dimension_numbers<[1], [0], [0], [1], [0, 0, 1, 1], [], []>} : vector<8x8xf32>, vector<8x1024xf32>, vector<8x1024xf32> -> vector<8x1024xf32>
      %25 = arith.addf %20, %24 : vector<8x1024xf32>
      %c6 = arith.constant 6 : index
      %c0_15 = arith.constant 0 : index
      %c0_16 = arith.constant 0 : index
      %26 = vector.load %arg3[%c6, %c0_15, %c0_16] : memref<9x8x8xf32, #tpu.memory_space<vmem>>, vector<1x8x8xf32>
      %27 = vector.shape_cast %26 : vector<1x8x8xf32> to vector<8x8xf32>
      %28 = vector.extract_strided_slice %13 {offsets = [0, 64], sizes = [8, 1024], strides = [1, 1]} : vector<8x1090xf32> to vector<8x1024xf32>
      %cst_17 = arith.constant dense<0.000000e+00> : vector<8x1024xf32>
      %29 = tpu.matmul %27, %28, %cst_17 {dimension_numbers = #tpu.dot_dimension_numbers<[1], [0], [0], [1], [0, 0, 1, 1], [], []>} : vector<8x8xf32>, vector<8x1024xf32>, vector<8x1024xf32> -> vector<8x1024xf32>
      %30 = arith.addf %25, %29 : vector<8x1024xf32>
      %c0_18 = arith.constant 0 : index
      %c0_19 = arith.constant 0 : index
      %31 = vector.load %arg7[%c0_18, %c0_19] : memref<2x1024xf32, #tpu.memory_space<vmem>>, vector<1x1024xf32>
      %32 = vector.broadcast %31 : vector<1x1024xf32> to vector<8x1024xf32>
      %33 = arith.mulf %30, %32 : vector<8x1024xf32>
      %34 = arith.addf %14, %33 : vector<8x1024xf32>
      %cst_20 = arith.constant 0.000000e+00 : f32
      %35 = vector.broadcast %cst_20 : f32 to vector<8x1024xf32>
      %c1 = arith.constant 1 : index
      %c0_21 = arith.constant 0 : index
      %c0_22 = arith.constant 0 : index
      %36 = vector.load %arg3[%c1, %c0_21, %c0_22] : memref<9x8x8xf32, #tpu.memory_space<vmem>>, vector<1x8x8xf32>
      %37 = vector.shape_cast %36 : vector<1x8x8xf32> to vector<8x8xf32>
      %38 = vector.extract_strided_slice %13 {offsets = [0, 1], sizes = [8, 1024], strides = [1, 1]} : vector<8x1090xf32> to vector<8x1024xf32>
      %cst_23 = arith.constant dense<0.000000e+00> : vector<8x1024xf32>
      %39 = tpu.matmul %37, %38, %cst_23 {dimension_numbers = #tpu.dot_dimension_numbers<[1], [0], [0], [1], [0, 0, 1, 1], [], []>} : vector<8x8xf32>, vector<8x1024xf32>, vector<8x1024xf32> -> vector<8x1024xf32>
      %40 = arith.addf %35, %39 : vector<8x1024xf32>
      %c4 = arith.constant 4 : index
      %c0_24 = arith.constant 0 : index
      %c0_25 = arith.constant 0 : index
      %41 = vector.load %arg3[%c4, %c0_24, %c0_25] : memref<9x8x8xf32, #tpu.memory_space<vmem>>, vector<1x8x8xf32>
      %42 = vector.shape_cast %41 : vector<1x8x8xf32> to vector<8x8xf32>
      %43 = vector.extract_strided_slice %13 {offsets = [0, 33], sizes = [8, 1024], strides = [1, 1]} : vector<8x1090xf32> to vector<8x1024xf32>
      %cst_26 = arith.constant dense<0.000000e+00> : vector<8x1024xf32>
      %44 = tpu.matmul %42, %43, %cst_26 {dimension_numbers = #tpu.dot_dimension_numbers<[1], [0], [0], [1], [0, 0, 1, 1], [], []>} : vector<8x8xf32>, vector<8x1024xf32>, vector<8x1024xf32> -> vector<8x1024xf32>
      %45 = arith.addf %40, %44 : vector<8x1024xf32>
      %c7 = arith.constant 7 : index
      %c0_27 = arith.constant 0 : index
      %c0_28 = arith.constant 0 : index
      %46 = vector.load %arg3[%c7, %c0_27, %c0_28] : memref<9x8x8xf32, #tpu.memory_space<vmem>>, vector<1x8x8xf32>
      %47 = vector.shape_cast %46 : vector<1x8x8xf32> to vector<8x8xf32>
      %48 = vector.extract_strided_slice %13 {offsets = [0, 65], sizes = [8, 1024], strides = [1, 1]} : vector<8x1090xf32> to vector<8x1024xf32>
      %cst_29 = arith.constant dense<0.000000e+00> : vector<8x1024xf32>
      %49 = tpu.matmul %47, %48, %cst_29 {dimension_numbers = #tpu.dot_dimension_numbers<[1], [0], [0], [1], [0, 0, 1, 1], [], []>} : vector<8x8xf32>, vector<8x1024xf32>, vector<8x1024xf32> -> vector<8x1024xf32>
      %50 = arith.addf %45, %49 : vector<8x1024xf32>
      %51 = arith.addf %34, %50 : vector<8x1024xf32>
      %cst_30 = arith.constant 0.000000e+00 : f32
      %52 = vector.broadcast %cst_30 : f32 to vector<8x1024xf32>
      %c2 = arith.constant 2 : index
      %c0_31 = arith.constant 0 : index
      %c0_32 = arith.constant 0 : index
      %53 = vector.load %arg3[%c2, %c0_31, %c0_32] : memref<9x8x8xf32, #tpu.memory_space<vmem>>, vector<1x8x8xf32>
      %54 = vector.shape_cast %53 : vector<1x8x8xf32> to vector<8x8xf32>
      %55 = vector.extract_strided_slice %13 {offsets = [0, 2], sizes = [8, 1024], strides = [1, 1]} : vector<8x1090xf32> to vector<8x1024xf32>
      %cst_33 = arith.constant dense<0.000000e+00> : vector<8x1024xf32>
      %56 = tpu.matmul %54, %55, %cst_33 {dimension_numbers = #tpu.dot_dimension_numbers<[1], [0], [0], [1], [0, 0, 1, 1], [], []>} : vector<8x8xf32>, vector<8x1024xf32>, vector<8x1024xf32> -> vector<8x1024xf32>
      %57 = arith.addf %52, %56 : vector<8x1024xf32>
      %c5 = arith.constant 5 : index
      %c0_34 = arith.constant 0 : index
      %c0_35 = arith.constant 0 : index
      %58 = vector.load %arg3[%c5, %c0_34, %c0_35] : memref<9x8x8xf32, #tpu.memory_space<vmem>>, vector<1x8x8xf32>
      %59 = vector.shape_cast %58 : vector<1x8x8xf32> to vector<8x8xf32>
      %60 = vector.extract_strided_slice %13 {offsets = [0, 34], sizes = [8, 1024], strides = [1, 1]} : vector<8x1090xf32> to vector<8x1024xf32>
      %cst_36 = arith.constant dense<0.000000e+00> : vector<8x1024xf32>
      %61 = tpu.matmul %59, %60, %cst_36 {dimension_numbers = #tpu.dot_dimension_numbers<[1], [0], [0], [1], [0, 0, 1, 1], [], []>} : vector<8x8xf32>, vector<8x1024xf32>, vector<8x1024xf32> -> vector<8x1024xf32>
      %62 = arith.addf %57, %61 : vector<8x1024xf32>
      %c8 = arith.constant 8 : index
      %c0_37 = arith.constant 0 : index
      %c0_38 = arith.constant 0 : index
      %63 = vector.load %arg3[%c8, %c0_37, %c0_38] : memref<9x8x8xf32, #tpu.memory_space<vmem>>, vector<1x8x8xf32>
      %64 = vector.shape_cast %63 : vector<1x8x8xf32> to vector<8x8xf32>
      %65 = vector.extract_strided_slice %13 {offsets = [0, 66], sizes = [8, 1024], strides = [1, 1]} : vector<8x1090xf32> to vector<8x1024xf32>
      %cst_39 = arith.constant dense<0.000000e+00> : vector<8x1024xf32>
      %66 = tpu.matmul %64, %65, %cst_39 {dimension_numbers = #tpu.dot_dimension_numbers<[1], [0], [0], [1], [0, 0, 1, 1], [], []>} : vector<8x8xf32>, vector<8x1024xf32>, vector<8x1024xf32> -> vector<8x1024xf32>
      %67 = arith.addf %62, %66 : vector<8x1024xf32>
      %c1_40 = arith.constant 1 : index
      %c0_41 = arith.constant 0 : index
      %68 = vector.load %arg7[%c1_40, %c0_41] : memref<2x1024xf32, #tpu.memory_space<vmem>>, vector<1x1024xf32>
      %69 = vector.broadcast %68 : vector<1x1024xf32> to vector<8x1024xf32>
      %70 = arith.mulf %67, %69 : vector<8x1024xf32>
      %71 = arith.addf %51, %70 : vector<8x1024xf32>
      %c0_42 = arith.constant 0 : index
      %c0_43 = arith.constant 0 : index
      %72 = vector.load %arg4[%c0_42, %c0_43] : memref<8x1xf32, #tpu.memory_space<vmem>>, vector<8x1xf32>
      %73 = vector.broadcast %72 : vector<8x1xf32> to vector<8x1024xf32>
      %74 = arith.addf %71, %73 : vector<8x1024xf32>
      %cst_44 = arith.constant 0.000000e+00 : f32
      %75 = vector.broadcast %cst_44 : f32 to vector<8x1024xf32>
      %76 = arith.maximumf %74, %75 : vector<8x1024xf32>
      %77 = arith.index_cast %arg1 : i32 to index
      %c0_45 = arith.constant 0 : index
      %c0_46 = arith.constant 0 : index
      %78 = vector.load %arg13[%77, %c0_45, %c0_46] : memref<2x8x1024xf32, #tpu.memory_space<vmem>>, vector<1x8x1024xf32>
      %79 = vector.shape_cast %78 : vector<1x8x1024xf32> to vector<8x1024xf32>
      %80 = vector.shape_cast %76 : vector<8x1024xf32> to vector<1x8x1024xf32>
      tpu.vector_store %arg13[%77, %c0_45, %c0_46], %80 {strides = array<i32>} : memref<2x8x1024xf32, #tpu.memory_space<vmem>>, vector<1x8x1024xf32>,
      %c0_47 = arith.constant 0 : index
      %c0_48 = arith.constant 0 : index
      %81 = vector.load %arg11[%c0_47, %c0_48] : memref<8x1xf32, #tpu.memory_space<vmem>>, vector<8x1xf32>
      %cst_49 = arith.constant dense<0.000000e+00> : vector<8xf32>
      %82 = vector.multi_reduction <add>, %76, %cst_49 [1] : vector<8x1024xf32> to vector<8xf32>
      %83 = vector.shape_cast %82 : vector<8xf32> to vector<8x1xf32>
      %84 = arith.addf %81, %83 : vector<8x1xf32>
      %c0_50 = arith.constant 0 : index
      %c0_51 = arith.constant 0 : index
      %85 = vector.load %arg11[%c0_50, %c0_51] : memref<8x1xf32, #tpu.memory_space<vmem>>, vector<8x1xf32>
      tpu.vector_store %arg11[%c0_50, %c0_51], %84 {strides = array<i32>} : memref<8x1xf32, #tpu.memory_space<vmem>>, vector<8x1xf32>,
      %c0_52 = arith.constant 0 : index
      %c0_53 = arith.constant 0 : index
      %86 = vector.load %arg12[%c0_52, %c0_53] : memref<8x1xf32, #tpu.memory_space<vmem>>, vector<8x1xf32>
      %87 = arith.mulf %76, %76 : vector<8x1024xf32>
      %cst_54 = arith.constant dense<0.000000e+00> : vector<8xf32>
      %88 = vector.multi_reduction <add>, %87, %cst_54 [1] : vector<8x1024xf32> to vector<8xf32>
      %89 = vector.shape_cast %88 : vector<8xf32> to vector<8x1xf32>
      %90 = arith.addf %86, %89 : vector<8x1xf32>
      %c0_55 = arith.constant 0 : index
      %c0_56 = arith.constant 0 : index
      %91 = vector.load %arg12[%c0_55, %c0_56] : memref<8x1xf32, #tpu.memory_space<vmem>>, vector<8x1xf32>
      tpu.vector_store %arg12[%c0_55, %c0_56], %90 {strides = array<i32>} : memref<8x1xf32, #tpu.memory_space<vmem>>, vector<8x1xf32>,
    } else {
    }
    %c1_i32 = arith.constant 1 : i32
    %8 = arith.cmpi eq, %arg0, %c1_i32 : i32
    %9 = arith.extui %8 : i1 to i32
    %c0_i32_4 = arith.constant 0 : i32
    %10 = arith.cmpi ne, %9, %c0_i32_4 : i32
    scf.if %10 {
      %11 = arith.index_cast %arg1 : i32 to index
      %c0 = arith.constant 0 : index
      %c0_5 = arith.constant 0 : index
      %12 = vector.load %arg13[%11, %c0, %c0_5] : memref<2x8x1024xf32, #tpu.memory_space<vmem>>, vector<1x8x1024xf32>
      %13 = vector.shape_cast %12 : vector<1x8x1024xf32> to vector<8x1024xf32>
      %c0_6 = arith.constant 0 : index
      %c0_7 = arith.constant 0 : index
      %14 = vector.load %arg11[%c0_6, %c0_7] : memref<8x1xf32, #tpu.memory_space<vmem>>, vector<8x1xf32>
      %cst = arith.constant 4.8828125E-4 : f32
      %15 = vector.broadcast %cst : f32 to vector<8x1xf32>
      %16 = arith.mulf %14, %15 : vector<8x1xf32>
      %c0_8 = arith.constant 0 : index
      %c0_9 = arith.constant 0 : index
      %17 = vector.load %arg12[%c0_8, %c0_9] : memref<8x1xf32, #tpu.memory_space<vmem>>, vector<8x1xf32>
      %cst_10 = arith.constant 4.8828125E-4 : f32
      %18 = vector.broadcast %cst_10 : f32 to vector<8x1xf32>
      %19 = arith.mulf %17, %18 : vector<8x1xf32>
      %20 = arith.mulf %16, %16 : vector<8x1xf32>
      %21 = arith.subf %19, %20 : vector<8x1xf32>
      %cst_11 = arith.constant 8.000000e-01 : f32
      %22 = vector.broadcast %cst_11 : f32 to vector<8x1xf32>
      %23 = arith.addf %21, %22 : vector<8x1xf32>
      %24 = math.rsqrt %23 : vector<8x1xf32>
      %c0_12 = arith.constant 0 : index
      %c0_13 = arith.constant 0 : index
      %25 = vector.load %arg5[%c0_12, %c0_13] : memref<8x1xf32, #tpu.memory_space<vmem>>, vector<8x1xf32>
      %26 = arith.mulf %25, %24 : vector<8x1xf32>
      %c0_14 = arith.constant 0 : index
      %c0_15 = arith.constant 0 : index
      %27 = vector.load %arg6[%c0_14, %c0_15] : memref<8x1xf32, #tpu.memory_space<vmem>>, vector<8x1xf32>
      %28 = arith.mulf %16, %26 : vector<8x1xf32>
      %29 = arith.subf %27, %28 : vector<8x1xf32>
      %30 = vector.broadcast %26 : vector<8x1xf32> to vector<8x1024xf32>
      %31 = arith.mulf %13, %30 : vector<8x1024xf32>
      %32 = vector.broadcast %29 : vector<8x1xf32> to vector<8x1024xf32>
      %33 = arith.addf %31, %32 : vector<8x1024xf32>
      %c0_16 = arith.constant 0 : index
      %c0_17 = arith.constant 0 : index
      %c0_18 = arith.constant 0 : index
      %34 = vector.load %arg10[%c0_16, %c0_17, %c0_18] : memref<1x16x1024xf32, #tpu.memory_space<vmem>>, vector<1x8x1024xf32>
      %35 = vector.shape_cast %34 : vector<1x8x1024xf32> to vector<8x1024xf32>
      %36 = vector.shape_cast %33 : vector<8x1024xf32> to vector<1x8x1024xf32>
      tpu.vector_store %arg10[%c0_16, %c0_17, %c0_18], %36 {strides = array<i32>} : memref<1x16x1024xf32, #tpu.memory_space<vmem>>, vector<1x8x1024xf32>,
      %c0_19 = arith.constant 0 : index
      %c0_20 = arith.constant 0 : index
      %c0_21 = arith.constant 0 : index
      %37 = vector.load %arg8[%c0_19, %c0_20, %c0_21] : memref<1x8x1024xbf16, #tpu.memory_space<vmem>>, vector<1x8x1024xbf16>
      %38 = vector.shape_cast %37 : vector<1x8x1024xbf16> to vector<8x1024xbf16>
      %39 = arith.extf %38 : vector<8x1024xbf16> to vector<8x1024xf32>
      %c0_22 = arith.constant 0 : index
      %c0_23 = arith.constant 0 : index
      %c0_24 = arith.constant 0 : index
      %40 = vector.load %arg9[%c0_22, %c0_23, %c0_24] : memref<1x1x1024xbf16, #tpu.memory_space<vmem>>, vector<1x1x1024xbf16>
      %41 = vector.shape_cast %40 : vector<1x1x1024xbf16> to vector<1x1024xbf16>
      %42 = arith.extf %41 : vector<1x1024xbf16> to vector<1x1024xf32>
      %43 = vector.broadcast %42 : vector<1x1024xf32> to vector<8x1024xf32>
      %44 = arith.mulf %39, %43 : vector<8x1024xf32>
      %c0_25 = arith.constant 0 : index
      %c8 = arith.constant 8 : index
      %c0_26 = arith.constant 0 : index
      %45 = vector.load %arg10[%c0_25, %c8, %c0_26] : memref<1x16x1024xf32, #tpu.memory_space<vmem>>, vector<1x8x1024xf32>
      %46 = vector.shape_cast %45 : vector<1x8x1024xf32> to vector<8x1024xf32>
      %47 = vector.shape_cast %44 : vector<8x1024xf32> to vector<1x8x1024xf32>
      tpu.vector_store %arg10[%c0_25, %c8, %c0_26], %47 {strides = array<i32>} : memref<1x16x1024xf32, #tpu.memory_space<vmem>>, vector<1x8x1024xf32>,
    } else {
    }
    return
  }
  func.func @transform_0(%arg0: i32, %arg1: i32) -> (i32, i32, i32) {
    %c1_i32 = arith.constant 1 : i32
    %0 = arith.subi %c1_i32, %arg0 : i32
    %1 = arith.muli %0, %arg1 : i32
    %c1_i32_0 = arith.constant 1 : i32
    %2 = arith.muli %arg0, %c1_i32_0 : i32
    %3 = arith.addi %1, %2 : i32
    %c0_i32 = arith.constant 0 : i32
    %c0_i32_1 = arith.constant 0 : i32
    %c0_i32_2 = arith.constant 0 : i32
    return %3, %c0_i32, %c0_i32_1 : i32, i32, i32
  }
  func.func @transform_1(%arg0: i32, %arg1: i32) -> (i32, i32, i32) {
    %c0_i32 = arith.constant 0 : i32
    %c0_i32_0 = arith.constant 0 : i32
    %c0_i32_1 = arith.constant 0 : i32
    %c0_i32_2 = arith.constant 0 : i32
    return %c0_i32, %c0_i32_0, %c0_i32_1 : i32, i32, i32
  }
  func.func @transform_2(%arg0: i32, %arg1: i32) -> (i32, i32) {
    %c0_i32 = arith.constant 0 : i32
    %c0_i32_0 = arith.constant 0 : i32
    %c0_i32_1 = arith.constant 0 : i32
    return %c0_i32, %c0_i32_0 : i32, i32
  }
  func.func @transform_3(%arg0: i32, %arg1: i32) -> (i32, i32) {
    %c0_i32 = arith.constant 0 : i32
    %c0_i32_0 = arith.constant 0 : i32
    %c0_i32_1 = arith.constant 0 : i32
    return %c0_i32, %c0_i32_0 : i32, i32
  }
  func.func @transform_4(%arg0: i32, %arg1: i32) -> (i32, i32) {
    %c0_i32 = arith.constant 0 : i32
    %c0_i32_0 = arith.constant 0 : i32
    %c0_i32_1 = arith.constant 0 : i32
    return %c0_i32, %c0_i32_0 : i32, i32
  }
  func.func @transform_5(%arg0: i32, %arg1: i32) -> (i32, i32) {
    %c0_i32 = arith.constant 0 : i32
    %c0_i32_0 = arith.constant 0 : i32
    %c0_i32_1 = arith.constant 0 : i32
    return %c0_i32, %c0_i32_0 : i32, i32
  }
  func.func @transform_6(%arg0: i32, %arg1: i32) -> (i32, i32, i32) {
    %0 = arith.muli %arg0, %arg1 : i32
    %c0_i32 = arith.constant 0 : i32
    %c0_i32_0 = arith.constant 0 : i32
    %c0_i32_1 = arith.constant 0 : i32
    return %0, %c0_i32, %c0_i32_0 : i32, i32, i32
  }
  func.func @transform_7(%arg0: i32, %arg1: i32) -> (i32, i32, i32) {
    %0 = arith.muli %arg0, %arg1 : i32
    %c0_i32 = arith.constant 0 : i32
    %c0_i32_0 = arith.constant 0 : i32
    %c0_i32_1 = arith.constant 0 : i32
    return %0, %c0_i32, %c0_i32_0 : i32, i32, i32
  }
  func.func @transform_8(%arg0: i32, %arg1: i32) -> (i32, i32, i32) {
    %0 = arith.muli %arg0, %arg1 : i32
    %c0_i32 = arith.constant 0 : i32
    %c0_i32_0 = arith.constant 0 : i32
    %c0_i32_1 = arith.constant 0 : i32
    return %0, %c0_i32, %c0_i32_0 : i32, i32, i32
  }
}

</mosaic_0001>

<bundles_post_ra>
// kernel: unet_up_forward.1
= control target key start
LH: loop header
LB: loop body
LE: loop exit
PB: predicated region body
PF: predicated region fallthrough
CT: control target
= control target key end

     0   :  { %s3005_s27 = smov 0   ;;  %s3007_s28 = smov 0   ;;  %s3374_s0 = inlined_call_operand.vmem [shape: bf16[2,8,1090], index: 0, kind: input, shape index: {}]   ;;  %s3375_s1 = inlined_call_operand.vmem [shape: f32[9,8,8], index: 1, kind: input, shape index: {}]   ;;  %s3376_s2 = inlined_call_operand.vmem [shape: f32[8,1], index: 2, kind: input, shape index: {}]   ;;  %s3377_s3 = inlined_call_operand.vmem [shape: f32[8,1], index: 3, kind: input, shape index: {}]   ;;  %s3378_s4 = inlined_call_operand.vmem [shape: f32[8,1], index: 4, kind: input, shape index: {}]   ;;  %s3379_s5 = inlined_call_operand.vmem [shape: f32[2,1024], index: 5, kind: input, shape index: {}]   ;;  %s3380_s6 = inlined_call_operand.vmem [shape: bf16[2,8,1024], index: 6, kind: input, shape index: {}]   ;;  %s3381_s7 = inlined_call_operand.vmem [shape: bf16[2,1,1024], index: 7, kind: input, shape index: {}]   ;;  %s3382_s8 = inlined_call_operand.vmem [shape: f32[2,16,1024], index: 8, kind: output, shape index: {}]  }
   0x1   :  { %s3009_s29 = smov 0   ;;  %s3011_s30 = smov 0  }
   0x2   :  { %s3013_s9 = smov 0  }
   0x3 LB: > { %3384 = sst [smem:[#allocation5_spill]] %s2943_s30  ;;  %s27_s10 = sadd.s32 1, %s2939_s29  ;;  %s2947_s9 = sphi %s3013_s9, %s18_s9   ;;  %s2943_s30 = sphi %s3011_s30, %s3389_s30   ;;  %s2939_s29 = sphi %s3009_s29, %s3391_s29   ;;  %s2935_s28 = sphi %s3007_s28, %s3387_s28   ;;  %s2931_s27 = sphi %s3005_s27, %s3390_s27  }
   0x4   : > { %s30_s11 = sadd.s32 1, %s2943_s30  ;;  %p28_p0 = scmp.ge.s32.totalorder %s27_s10, 2 }
   0x5   : > { %p2592_p1 = scmp.ge.s32.totalorder %s2947_s9, 1  ;;  %p315_p2 = scmp.lt.s32.totalorder %s2947_s9, 5 }
   0x6   : > { %s3393_s10 = smov (%p28_p0, %s27_s10), 0  ;;  %s3395_s11 = smov (!%p28_p0, %s30_s11), %s2943_s30 }
   0x7   : > { %3385 = sst [smem:[#allocation6_spill]] %s3393_s10  ;;  %p316_p3 = pnand %p2592_p1, %p315_p2 }
   0x8   : > { %p32_p4 = scmp.ge.s32.totalorder %s3395_s11, 2  ;;  %s364_s12 = ssub.s32 (!%p316_p3), 1, %s2935_s28 }
   0x9   : > { %319 = sbr.rel (%p316_p3) target bundleno = 739 (0x2e3), region = 52  ;;  %p395_p5 = scmp.eq.s32.totalorder (!%p316_p3), %s2935_s28, 0 }
   0xa   : > { %s3397_s11 = smov (%p32_p4, %s3395_s11), 0  ;;  %s375_s13 = smul.u32 (!%p316_p3), %s2931_s27, %s2935_s28 }
   0xb   : > { %3386 = sst [smem:[#allocation7_spill]] %s3397_s11  ;;  %s365_s14 = smul.u32 (!%p316_p3), %s2931_s27, %s364_s12 }
   0xc   : > { %p376_p6 = scmp.lt.s32.totalorder (!%p316_p3), %s375_s13, 1  ;;  %p396_p7 = scmp.eq.s32.totalorder (!%p316_p3), %s2931_s27, 0 }
   0xd   : > { %s366_s15 = sadd.s32 (!%p316_p3), %s2935_s28, %s365_s14 }
   0xe   : > { %p367_p8 = scmp.lt.s32.totalorder %s366_s15, 1  ;;  %p397_p9 = pnand %p396_p7, %p395_p5 }
   0xf   : > { %s3399_s13 = smov (!%p376_p6, %s375_s13), 1 }
  0x10   : > { %s3401_s15 = smov (!%p367_p8, %s366_s15), 1  ;;  %s2688_s16 = sshll.u32 %s3399_s13, 5 }
  0x11   : > { %s2596_s17 = sshll.u32 %s3399_s13, 3  ;;  %s2692_s18 = smul.u32 36, %s3401_s15 }
  0x12   : > { %s3049_s21 = scalar_lea.vmem %s3380_s6, %s2688_s16  ;;  %s3054_s24 = scalar_lea.vmem %s3381_s7, %s2596_s17 }
  0x13   : > { %s2689_s25 = sshll.u32 %s3399_s13, 7  ;;  %s371_s14 = scalar_lea.vmem %s3374_s0, %s2692_s18 }
  0x14   : > { %s3062_s30 = scalar_lea.vmem %s3382_s8, %s2689_s25  ;;  %400 = sbr.rel (%p397_p9) target bundleno = 28 (0x1c), region = 56 }
  0x19   : > { %vm401_vm0 = vcmask 7168   ;;  %v2949_v0 = vmov 0.0  }
  0x1a   : > { %402 = vst.msk [vmem:[#allocation2] sm:$0xff] %vm401_vm0, %v2949_v0 }
  0x1b   : > { %403 = vst.msk [vmem:[#allocation3] sm:$0xff] %vm401_vm0, %v2949_v0 }
  0x1c PF: > { %p2599_p10 = scmp.ne.s32.totalorder %s2935_s28, 0 }
  0x1d   : > { %s2950_s10 = smov (!%p2599_p10), 96   ;;  %s2951_s11 = smov (!%p2599_p10), 64  }
  0x1e   : > { %406 = sbr.rel (%p2599_p10) target bundleno = 570 (0x23a), region = 60  ;;  %s2952_s13 = smov (!%p2599_p10), 95  }
  0x1f   : > { %s2953_s15 = smov (!%p2599_p10), 127   ;;  %s2954_s16 = smov (!%p2599_p10), 63  }
  0x20   : > { %s2955_s17 = smov (!%p2599_p10), 94   ;;  %s2956_s18 = smov (!%p2599_p10), 126  }
  0x21   : > { %s2957_s19 = smov (!%p2599_p10), 62  }
  0x23   : > { %v3065_v1 = vld [vmem:[%s371_s14 + $0x10] sm:$0xff]  ;;  %v3067_v2 = vld [vmem:[%s371_s14 + $0x18] sm:$0xff]  ;;  %v3069_v3 = vld [vmem:[%s371_s14 + $0x8] sm:$0xff]  ;;  %vm451_vm1 = vcmask 785408   ;;  %vm468_vm2 = vcmask 64512   ;;  %vm815_vm3 = vcmask 523264  }
  0x24   : > { %v416_v4 = vunpack.c.l.bf16 %v3065_v1  ;;  %v418_v5 = vunpack.c.l.bf16 %v3067_v2  ;;  %v411_v6 = vld [vmem:[%s371_s14 + $0x20] sm:$0xf]  ;;  %v414_v7 = vunpack.c.l.bf16 %v3069_v3  ;;  %v415_v8 = vunpack.c.h.bf16 %v3069_v3  ;;  %v2600_v25 = vld [vmem:[%s3375_s1 + $0x18] sm:$0xff] }
  0x25   : > { %v3079_v10 = vld [vmem:[%s371_s14] sm:$0xff]  ;;  %v420_v11 = vunpack.c.l.bf16 %v411_v6  ;;  %v417_v13 = vunpack.c.h.bf16 %v3065_v1  ;;  %v419_v14 = vunpack.c.h.bf16 %v3067_v2  ;;  %vm1059_vm4 = vcmask 777216   ;;  %v2617_v6 = vld [vmem:[%s3375_s1 + $0x30] sm:$0xff] }
  0x26   : > { %v2754_v9 = vpack.i.bf16 %v418_v5, %v416_v4  ;;  %v2744_v12 = vpack.i.bf16 %v415_v8, %v414_v7  ;;  %v412_v15 = vunpack.c.l.bf16 %v3079_v10  ;;  %v413_v16 = vunpack.c.h.bf16 %v3079_v10  ;;  %v421_v48 = vld [vmem:[%s3375_s1] sm:$0xff] }
  0x27   : > { %449 = vrot.lane.b32.xlu2 %v420_v11, %s2950_s10  ;;  %v3093_v17 = vpack.i.bf16 %v417_v13, %v419_v14  ;;  %vm1257_vm5 = vcmask 1039360   ;;  %vm1457_vm6 = vcmask 515072   ;;  %vm1675_vm7 = vcmask 769024  }
  0x28   : > { %2755 = vrot.lane.b32.xlu1 %v2754_v9, %s2950_s10  ;;  %2745 = vrot.lane.b32.xlu0 %v2744_v12, %s2950_s10  ;;  %v2749_v18 = vpack.i.bf16 %v413_v16, %v412_v15  ;;  %vm1873_vm8 = vcmask 1031168   ;;  %vm2073_vm9 = vcmask 506880   ;;  %vm2340_vm10 = vcmask 7168  }
  0x2f   : > { %2765 = vrot.lane.b32.xlu2 %v2744_v12, %s2951_s11 }
  0x30   : > { %2760 = vrot.lane.b32.xlu1 %v3093_v17, %s2950_s10  ;;  %2750 = vrot.lane.b32.xlu0 %v2749_v18, %s2950_s10 }
  0x37   : > { %2780 = vrot.lane.b32.xlu2 %v3093_v17, %s2951_s11 }
  0x38   : > { %2775 = vrot.lane.b32.xlu1 %v2754_v9, %s2951_s11  ;;  %2770 = vrot.lane.b32.xlu0 %v2749_v18, %s2951_s11 }
  0x3f   : > { %2790 = vrot.lane.b32.xlu2 %v2749_v18, %s2952_s13 }
  0x40   : > { %2785 = vrot.lane.b32.xlu1 %v2744_v12, %s2952_s13  ;;  %813 = vrot.lane.b32.xlu0 %v420_v11, %s2951_s11 }
  0x47   : > { %1057 = vrot.lane.b32.xlu2 %v420_v11, %s2952_s13 }
  0x48   : > { %2800 = vrot.lane.b32.xlu1 %v3093_v17, %s2952_s13  ;;  %2795 = vrot.lane.b32.xlu0 %v2754_v9, %s2952_s13  ;;  %s2690_s13 = sshll.u32 %s2931_s27, 6 }
  0x4f   : > { %2815 = vrot.lane.b32.xlu2 %v2754_v9, %s2953_s15 }
  0x50   : > { %2810 = vrot.lane.b32.xlu1 %v2749_v18, %s2953_s15  ;;  %2805 = vrot.lane.b32.xlu0 %v2744_v12, %s2953_s15 }
  0x57   : > { %2825 = vrot.lane.b32.xlu2 %v2744_v12, %s2954_s16 }
  0x58   : > { %1255 = vrot.lane.b32.xlu1 %v420_v11, %s2953_s15  ;;  %2820 = vrot.lane.b32.xlu0 %v3093_v17, %s2953_s15  ;;  %s3316_s15 = scalar_lea.vmem [#allocation4], %s2690_s13 }
  0x5f   : > { %2840 = vrot.lane.b32.xlu2 %v3093_v17, %s2954_s16 }
  0x60   : > { %2835 = vrot.lane.b32.xlu1 %v2754_v9, %s2954_s16  ;;  %2830 = vrot.lane.b32.xlu0 %v2749_v18, %s2954_s16 }
  0x67   : > { %2850 = vrot.lane.b32.xlu2 %v2749_v18, %s2955_s17 }
  0x68   : > { %2845 = vrot.lane.b32.xlu1 %v2744_v12, %s2955_s17  ;;  %1455 = vrot.lane.b32.xlu0 %v420_v11, %s2954_s16 }
  0x6f   : > { %1673 = vrot.lane.b32.xlu2 %v420_v11, %s2955_s17 }
  0x70   : > { %2860 = vrot.lane.b32.xlu1 %v3093_v17, %s2955_s17  ;;  %2855 = vrot.lane.b32.xlu0 %v2754_v9, %s2955_s17 }
  0x77   : > { %2875 = vrot.lane.b32.xlu2 %v2754_v9, %s2956_s18 }
  0x78   : > { %2870 = vrot.lane.b32.xlu1 %v2749_v18, %s2956_s18  ;;  %2865 = vrot.lane.b32.xlu0 %v2744_v12, %s2956_s18 }
  0x7f   : > { %2885 = vrot.lane.b32.xlu2 %v2744_v12, %s2957_s19 }
  0x80   : > { %1871 = vrot.lane.b32.xlu1 %v420_v11, %s2956_s18  ;;  %2880 = vrot.lane.b32.xlu0 %v3093_v17, %s2956_s18 }
  0x81   : > { %v450_v19 = vpop.permute.xlu2 %449 }
  0x87   : > { %2900 = vrot.lane.b32.xlu2 %v3093_v17, %s2957_s19 }
  0x88   : > { %2895 = vrot.lane.b32.xlu1 %v2754_v9, %s2957_s19  ;;  %2890 = vrot.lane.b32.xlu0 %v2749_v18, %s2957_s19 }
  0x89   : > { %v2766_v28 = vpop.permute.xlu2 %2765 }
  0x8a   : > { %v2768_v45 = vunpack.i.h.bf16 %v2766_v28  ;;  %v2767_v46 = vunpack.i.l.bf16 %v2766_v28  ;;  %v2627_v28 = vld [vmem:[%s3375_s1 + $0x20] sm:$0xff] }
  0x8c   : > { %v818_v49 = vsel %vm815_vm3, %v2767_v46, %v2768_v45 }
  0x90   : > { %2071 = vrot.lane.b32.xlu0 %v420_v11, %s2957_s19 }
  0x91   : > { %v2781_v44 = vpop.permute.xlu2 %2780 }
  0x92   : > { %v2782_v56 = vunpack.i.l.bf16 %v2781_v44  ;;  %v2783_v62 = vunpack.i.h.bf16 %v2781_v44 }
  0x99   : > { %v2791_v57 = vpop.permute.xlu2 %2790 }
  0x9a   : > { %v2756_v20 = vpop.permute.xlu1 %2755  ;;  %v2746_v22 = vpop.permute.xlu0 %2745  ;;  %v2793_v10 = vunpack.i.h.bf16 %v2791_v57  ;;  %v2792_v11 = vunpack.i.l.bf16 %v2791_v57 }
  0x9b   : > { %v2757_v21 = vunpack.i.l.bf16 %v2756_v20  ;;  %v2748_v23 = vunpack.i.h.bf16 %v2746_v22  ;;  %v2747_v24 = vunpack.i.l.bf16 %v2746_v22  ;;  %v2758_v30 = vunpack.i.h.bf16 %v2756_v20 }
  0x9c   : > { %v1060_v17 = vsel %vm1059_vm4, %v2792_v11, %v2793_v10 }
  0x9d   : > { %v454_v26 = vsel %vm451_vm1, %v2747_v24, %v2748_v23  ;;  %v455_v27 = vsel %vm451_vm1, %v2748_v23, %v2757_v21 }
  0x9e   : > { %527 = vmatpush.msra.mxu2 %v454_v26  ;;  %547 = vmatpush.msra.mxu3 %v455_v27 }
  0x9f   : > { %2603 = vmatmul.msk.f32.vlgmr.msra.gmra.mxu2 %vm468_vm2, %v2600_v25  ;;  %2604 = vmatmul.msk.f32.vlgmr.msra.gmra.mxu3 %vm468_vm2, %v2600_v25 }
  0xa2   : > { %v2761_v29 = vpop.permute.xlu1 %2760  ;;  %v2751_v33 = vpop.permute.xlu0 %2750 }
  0xa3   : > { %v2763_v31 = vunpack.i.h.bf16 %v2761_v29  ;;  %v2762_v32 = vunpack.i.l.bf16 %v2761_v29  ;;  %v2753_v34 = vunpack.i.h.bf16 %v2751_v33  ;;  %v2752_v35 = vunpack.i.l.bf16 %v2751_v33 }
  0xa5   : > { %v458_v36 = vsel %vm451_vm1, %v2758_v30, %v2762_v32  ;;  %v459_v37 = vsel %vm451_vm1, %v2762_v32, %v450_v19  ;;  %v456_v38 = vsel %vm451_vm1, %v2757_v21, %v2763_v31  ;;  %v452_v39 = vsel %vm451_vm1, %v2752_v35, %v2753_v34 }
  0xa6   : > { %v453_v40 = vsel %vm451_vm1, %v2753_v34, %v2747_v24  ;;  %607 = vmatpush.msrb.mxu2 %v458_v36  ;;  %627 = vmatpush.msrb.mxu3 %v459_v37  ;;  %v457_v41 = vsel %vm451_vm1, %v2763_v31, %v2758_v30 }
  0xa7   : > { %487 = vmatpush.msra.mxu0 %v452_v39  ;;  %507 = vmatpush.msra.mxu1 %v453_v40 }
  0xa8   : > { %2601 = vmatmul.msk.f32.vlgmr.msra.gmra.mxu0 %vm468_vm2, %v2600_v25  ;;  %2602 = vmatmul.msk.f32.vlgmr.msra.gmra.mxu1 %vm468_vm2, %v2600_v25 }
  0xa9   : > { %567 = vmatpush.msrb.mxu0 %v456_v38  ;;  %587 = vmatpush.msrb.mxu1 %v457_v41 }
  0xaa   : > { %2607 = vmatmul.msk.f32.vlgmr.msrb.gmra.mxu2 %vm468_vm2, %v2600_v25  ;;  %2608 = vmatmul.msk.f32.vlgmr.msrb.gmra.mxu3 %vm468_vm2, %v2600_v25  ;;  %v2776_v42 = vpop.permute.xlu1 %2775  ;;  %v2771_v43 = vpop.permute.xlu0 %2770 }
  0xab   : > { %690 = vmatpush.msra.mxu2 %v414_v7  ;;  %710 = vmatpush.msra.mxu3 %v415_v8  ;;  %v2777_v47 = vunpack.i.l.bf16 %v2776_v42  ;;  %v2773_v51 = vunpack.i.h.bf16 %v2771_v43  ;;  %v2772_v52 = vunpack.i.l.bf16 %v2771_v43  ;;  %v2778_v55 = vunpack.i.h.bf16 %v2776_v42  ;;  %v1058_v7 = vpop.permute.xlu2 %1057 }
  0xac   : > { %650 = vmatpush.msra.mxu0 %v412_v15  ;;  %670 = vmatpush.msra.mxu1 %v413_v16 }
  0xad   : > { %770 = vmatpush.msrb.mxu2 %v418_v5  ;;  %790 = vmatpush.msrb.mxu3 %v419_v14  ;;  %v819_v50 = vsel %vm815_vm3, %v2768_v45, %v2777_v47  ;;  %v817_v58 = vsel %vm815_vm3, %v2773_v51, %v2767_v46  ;;  %v816_v59 = vsel %vm815_vm3, %v2772_v52, %v2773_v51 }
  0xae   : > { %v822_v60 = vsel %vm815_vm3, %v2778_v55, %v2782_v56  ;;  %v821_v5 = vsel %vm815_vm3, %v2783_v62, %v2778_v55 }
  0xb0   : > { %2605 = vmatmul.msk.f32.vlgmr.msrb.gmra.mxu0 %vm468_vm2, %v2600_v25  ;;  %2606 = vmatmul.msk.f32.vlgmr.msrb.gmra.mxu1 %vm468_vm2, %v2600_v25 }
  0xb1   : > { %730 = vmatpush.msrb.mxu0 %v416_v4  ;;  %750 = vmatpush.msrb.mxu1 %v417_v13  ;;  %v820_v4 = vsel %vm815_vm3, %v2777_v47, %v2783_v62 }
  0xb2   : > { %2611 = vmatmul.msk.f32.vlgmr.msra.gmra.mxu2 %vm468_vm2, %v421_v48  ;;  %2612 = vmatmul.msk.f32.vlgmr.msra.gmra.mxu3 %vm468_vm2, %v421_v48  ;;  %v2786_v53 = vpop.permute.xlu1 %2785  ;;  %v814_v54 = vpop.permute.xlu0 %813 }
  0xb3   : > { %890 = vmatpush.msra.mxu2 %v818_v49  ;;  %910 = vmatpush.msra.mxu3 %v819_v50  ;;  %v823_v61 = vsel %vm815_vm3, %v2782_v56, %v814_v54  ;;  %v2788_v1 = vunpack.i.h.bf16 %v2786_v53  ;;  %v2787_v2 = vunpack.i.l.bf16 %v2786_v53  ;;  %v2816_v20 = vpop.permute.xlu2 %2815  ;;  %v2626_v50 = vld [vmem:[%s3375_s1 + $0x8] sm:$0xff] }
  0xb4   : > { %v2817_v25 = vunpack.i.l.bf16 %v2816_v20  ;;  %v2818_v35 = vunpack.i.h.bf16 %v2816_v20 }
  0xb5   : > { %v1062_v8 = vsel %vm1059_vm4, %v2787_v2, %v2788_v1  ;;  %v1061_v16 = vsel %vm1059_vm4, %v2793_v10, %v2787_v2 }
  0xb8   : > { %2609 = vmatmul.msk.f32.vlgmr.msra.gmra.mxu0 %vm468_vm2, %v421_v48  ;;  %2610 = vmatmul.msk.f32.vlgmr.msra.gmra.mxu1 %vm468_vm2, %v421_v48 }
  0xb9   : > { %870 = vmatpush.msra.mxu1 %v817_v58  ;;  %850 = vmatpush.msra.mxu0 %v816_v59 }
  0xba   : > { %2615 = vmatmul.msk.f32.vlgmr.msrb.gmra.mxu2 %vm468_vm2, %v421_v48  ;;  %2616 = vmatmul.msk.f32.vlgmr.msrb.gmra.mxu3 %vm468_vm2, %v421_v48  ;;  %v2796_v63 = vpop.permute.xlu0 %2795  ;;  %v2801_v0 = vpop.permute.xlu1 %2800 }
  0xbb   : > { %970 = vmatpush.msrb.mxu2 %v822_v60  ;;  %990 = vmatpush.msrb.mxu3 %v823_v61  ;;  %v2797_v3 = vunpack.i.l.bf16 %v2796_v63  ;;  %v2798_v13 = vunpack.i.h.bf16 %v2796_v63  ;;  %v2802_v14 = vunpack.i.l.bf16 %v2801_v0  ;;  %v2803_v21 = vunpack.i.h.bf16 %v2801_v0  ;;  %v2826_v32 = vpop.permute.xlu2 %2825 }
  0xbc   : > { %v2828_v45 = vunpack.i.h.bf16 %v2826_v32  ;;  %v2827_v46 = vunpack.i.l.bf16 %v2826_v32 }
  0xbd   : > { %v1063_v9 = vsel %vm1059_vm4, %v2788_v1, %v2797_v3  ;;  %v1066_v18 = vsel %vm1059_vm4, %v2798_v13, %v2802_v14  ;;  %v1067_v19 = vsel %vm1059_vm4, %v2802_v14, %v1058_v7  ;;  %v1064_v26 = vsel %vm1059_vm4, %v2797_v3, %v2803_v21 }
  0xbe   : > { %v1065_v27 = vsel %vm1059_vm4, %v2803_v21, %v2798_v13  ;;  %v1460_v52 = vsel %vm1457_vm6, %v2827_v46, %v2828_v45 }
  0xc0   : > { %2613 = vmatmul.msk.f32.vlgmr.msrb.gmra.mxu0 %vm468_vm2, %v421_v48  ;;  %2614 = vmatmul.msk.f32.vlgmr.msrb.gmra.mxu1 %vm468_vm2, %v421_v48 }
  0xc1   : > { %930 = vmatpush.msrb.mxu0 %v820_v4  ;;  %950 = vmatpush.msrb.mxu1 %v821_v5 }
  0xc2   : > { %2620 = vmatmul.msk.f32.vlgmr.msra.gmra.mxu2 %vm468_vm2, %v2617_v6  ;;  %2621 = vmatmul.msk.f32.vlgmr.msra.gmra.mxu3 %vm468_vm2, %v2617_v6  ;;  %v2806_v12 = vpop.permute.xlu0 %2805  ;;  %v2811_v15 = vpop.permute.xlu1 %2810 }
  0xc3   : > { %1134 = vmatpush.msra.mxu2 %v1062_v8  ;;  %1154 = vmatpush.msra.mxu3 %v1063_v9  ;;  %v2808_v23 = vunpack.i.h.bf16 %v2806_v12  ;;  %v2807_v24 = vunpack.i.l.bf16 %v2806_v12  ;;  %v2813_v33 = vunpack.i.h.bf16 %v2811_v15  ;;  %v2812_v34 = vunpack.i.l.bf16 %v2811_v15  ;;  %v2841_v44 = vpop.permute.xlu2 %2840  ;;  %v2644_v8 = vld [vmem:[%s3375_s1 + $0x38] sm:$0xff] }
  0xc4   : > { %v2842_v58 = vunpack.i.l.bf16 %v2841_v44  ;;  %v2843_v1 = vunpack.i.h.bf16 %v2841_v44 }
  0xc5   : > { %v1260_v30 = vsel %vm1257_vm5, %v2807_v24, %v2808_v23  ;;  %v1261_v31 = vsel %vm1257_vm5, %v2808_v23, %v2817_v25  ;;  %v1259_v38 = vsel %vm1257_vm5, %v2813_v33, %v2807_v24  ;;  %v1258_v39 = vsel %vm1257_vm5, %v2812_v34, %v2813_v33 }
  0xc8   : > { %2618 = vmatmul.msk.f32.vlgmr.msra.gmra.mxu0 %vm468_vm2, %v2617_v6  ;;  %2619 = vmatmul.msk.f32.vlgmr.msra.gmra.mxu1 %vm468_vm2, %v2617_v6 }
  0xc9   : > { %1114 = vmatpush.msra.mxu1 %v1061_v16  ;;  %1094 = vmatpush.msra.mxu0 %v1060_v17 }
  0xca   : > { %2624 = vmatmul.msk.f32.vlgmr.msrb.gmra.mxu2 %vm468_vm2, %v2617_v6  ;;  %2625 = vmatmul.msk.f32.vlgmr.msrb.gmra.mxu3 %vm468_vm2, %v2617_v6  ;;  %v2821_v22 = vpop.permute.xlu0 %2820  ;;  %v1256_v29 = vpop.permute.xlu1 %1255 }
  0xcb   : > { %1214 = vmatpush.msrb.mxu2 %v1066_v18  ;;  %1234 = vmatpush.msrb.mxu3 %v1067_v19  ;;  %v2822_v36 = vunpack.i.l.bf16 %v2821_v22  ;;  %v2823_v43 = vunpack.i.h.bf16 %v2821_v22  ;;  %v2851_v59 = vpop.permute.xlu2 %2850 }
  0xcc   : > { %v2853_v12 = vunpack.i.h.bf16 %v2851_v59  ;;  %v2852_v13 = vunpack.i.l.bf16 %v2851_v59 }
  0xcd   : > { %v1264_v40 = vsel %vm1257_vm5, %v2818_v35, %v2822_v36  ;;  %v1265_v41 = vsel %vm1257_vm5, %v2822_v36, %v1256_v29  ;;  %v1262_v48 = vsel %vm1257_vm5, %v2817_v25, %v2823_v43  ;;  %v1263_v49 = vsel %vm1257_vm5, %v2823_v43, %v2818_v35  ;;  %v2654_v29 = vld [vmem:[%s3375_s1 + $0x28] sm:$0xff] }
  0xce   : > { %v1676_v18 = vsel %vm1675_vm7, %v2852_v13, %v2853_v12 }
  0xd0   : > { %2622 = vmatmul.msk.f32.vlgmr.msrb.gmra.mxu0 %vm468_vm2, %v2617_v6  ;;  %2623 = vmatmul.msk.f32.vlgmr.msrb.gmra.mxu1 %vm468_vm2, %v2617_v6 }
  0xd1   : > { %1174 = vmatpush.msrb.mxu0 %v1064_v26  ;;  %1194 = vmatpush.msrb.mxu1 %v1065_v27 }
  0xd2   : > { %2630 = vmatmul.msk.f32.vlgmr.msra.gmra.mxu2 %vm468_vm2, %v2627_v28  ;;  %2631 = vmatmul.msk.f32.vlgmr.msra.gmra.mxu3 %vm468_vm2, %v2627_v28  ;;  %v2831_v37 = vpop.permute.xlu0 %2830  ;;  %v2836_v42 = vpop.permute.xlu1 %2835 }
  0xd3   : > { %1332 = vmatpush.msra.mxu2 %v1260_v30  ;;  %1352 = vmatpush.msra.mxu3 %v1261_v31  ;;  %v2837_v47 = vunpack.i.l.bf16 %v2836_v42  ;;  %v2833_v55 = vunpack.i.h.bf16 %v2831_v37  ;;  %v2832_v56 = vunpack.i.l.bf16 %v2831_v37  ;;  %v2838_v57 = vunpack.i.h.bf16 %v2836_v42  ;;  %v1674_v9 = vpop.permute.xlu2 %1673 }
  0xd5   : > { %v1461_v53 = vsel %vm1457_vm6, %v2828_v45, %v2837_v47  ;;  %v1459_v60 = vsel %vm1457_vm6, %v2833_v55, %v2827_v46  ;;  %v1458_v61 = vsel %vm1457_vm6, %v2832_v56, %v2833_v55  ;;  %v1464_v62 = vsel %vm1457_vm6, %v2838_v57, %v2842_v58 }
  0xd6   : > { %v1462_v6 = vsel %vm1457_vm6, %v2837_v47, %v2843_v1  ;;  %v1463_v7 = vsel %vm1457_vm6, %v2843_v1, %v2838_v57  ;;  %v2296_v1 = vld [vmem:[%s3376_s2] sm:$0xff] }
  0xd8   : > { %2628 = vmatmul.msk.f32.vlgmr.msra.gmra.mxu0 %vm468_vm2, %v2627_v28  ;;  %2629 = vmatmul.msk.f32.vlgmr.msra.gmra.mxu1 %vm468_vm2, %v2627_v28 }
  0xd9   : > { %1312 = vmatpush.msra.mxu1 %v1259_v38  ;;  %1292 = vmatpush.msra.mxu0 %v1258_v39 }
  0xda   : > { %2634 = vmatmul.msk.f32.vlgmr.msrb.gmra.mxu2 %vm468_vm2, %v2627_v28  ;;  %2635 = vmatmul.msk.f32.vlgmr.msrb.gmra.mxu3 %vm468_vm2, %v2627_v28  ;;  %v1456_v51 = vpop.permute.xlu0 %1455  ;;  %v2846_v54 = vpop.permute.xlu1 %2845 }
  0xdb   : > { %1412 = vmatpush.msrb.mxu2 %v1264_v40  ;;  %1432 = vmatpush.msrb.mxu3 %v1265_v41  ;;  %v1465_v63 = vsel %vm1457_vm6, %v2842_v58, %v1456_v51  ;;  %v2848_v3 = vunpack.i.h.bf16 %v2846_v54  ;;  %v2847_v4 = vunpack.i.l.bf16 %v2846_v54  ;;  %v2876_v22 = vpop.permute.xlu2 %2875  ;;  %v2653_v51 = vld [vmem:[%s3375_s1 + $0x10] sm:$0xff] }
  0xdc   : > { %v2877_v26 = vunpack.i.l.bf16 %v2876_v22  ;;  %v2878_v36 = vunpack.i.h.bf16 %v2876_v22 }
  0xdd   : > { %v1678_v10 = vsel %vm1675_vm7, %v2847_v4, %v2848_v3  ;;  %v1677_v17 = vsel %vm1675_vm7, %v2853_v12, %v2847_v4 }
  0xe0   : > { %2632 = vmatmul.msk.f32.vlgmr.msrb.gmra.mxu0 %vm468_vm2, %v2627_v28  ;;  %2633 = vmatmul.msk.f32.vlgmr.msrb.gmra.mxu1 %vm468_vm2, %v2627_v28 }
  0xe1   : > { %1372 = vmatpush.msrb.mxu0 %v1262_v48  ;;  %1392 = vmatpush.msrb.mxu1 %v1263_v49 }
  0xe2   : > { %2638 = vmatmul.msk.f32.vlgmr.msra.gmra.mxu2 %vm468_vm2, %v2626_v50  ;;  %2639 = vmatmul.msk.f32.vlgmr.msra.gmra.mxu3 %vm468_vm2, %v2626_v50  ;;  %v2856_v0 = vpop.permute.xlu0 %2855  ;;  %v2861_v2 = vpop.permute.xlu1 %2860 }
  0xe3   : > { %1532 = vmatpush.msra.mxu2 %v1460_v52  ;;  %1552 = vmatpush.msra.mxu3 %v1461_v53  ;;  %v2857_v5 = vunpack.i.l.bf16 %v2856_v0  ;;  %v2858_v14 = vunpack.i.h.bf16 %v2856_v0  ;;  %v2862_v15 = vunpack.i.l.bf16 %v2861_v2  ;;  %v2863_v23 = vunpack.i.h.bf16 %v2861_v2  ;;  %v2886_v40 = vpop.permute.xlu2 %2885 }
  0xe4   : > { %v2888_v46 = vunpack.i.h.bf16 %v2886_v40  ;;  %v2887_v47 = vunpack.i.l.bf16 %v2886_v40  ;;  %v2958_v2 = vmov 0  }
  0xe5   : > { %v1679_v11 = vsel %vm1675_vm7, %v2848_v3, %v2857_v5  ;;  %v1682_v20 = vsel %vm1675_vm7, %v2858_v14, %v2862_v15  ;;  %v1683_v21 = vsel %vm1675_vm7, %v2862_v15, %v1674_v9  ;;  %v1680_v27 = vsel %vm1675_vm7, %v2857_v5, %v2863_v23  ;;  %2904 = vset.pattern.permute.xlu1 %v2958_v2  ;;  %v2671_v5 = vld [vmem:[%s3375_s1 + $0x40] sm:$0xff] }
  0xe6   : > { %v1681_v28 = vsel %vm1675_vm7, %v2863_v23, %v2858_v14  ;;  %v2076_v52 = vsel %vm2073_vm9, %v2887_v47, %v2888_v46  ;;  %2905 = vset.pattern.permute.xlu0 %v2958_v2  ;;  %2299 = vperm.xlu1 %2904, %v2296_v1  }
  0xe8   : > { %2636 = vmatmul.msk.f32.vlgmr.msra.gmra.mxu0 %vm468_vm2, %v2626_v50  ;;  %2637 = vmatmul.msk.f32.vlgmr.msra.gmra.mxu1 %vm468_vm2, %v2626_v50 }
  0xe9   : > { %1512 = vmatpush.msra.mxu1 %v1459_v60  ;;  %1492 = vmatpush.msra.mxu0 %v1458_v61 }
  0xea   : > { %2642 = vmatmul.msk.f32.vlgmr.msrb.gmra.mxu2 %vm468_vm2, %v2626_v50  ;;  %2643 = vmatmul.msk.f32.vlgmr.msrb.gmra.mxu3 %vm468_vm2, %v2626_v50  ;;  %v2871_v16 = vpop.permute.xlu1 %2870  ;;  %v2866_v19 = vpop.permute.xlu0 %2865 }
  0xeb   : > { %1612 = vmatpush.msrb.mxu2 %v1464_v62  ;;  %1632 = vmatpush.msrb.mxu3 %v1465_v63  ;;  %v2868_v24 = vunpack.i.h.bf16 %v2866_v19  ;;  %v2867_v25 = vunpack.i.l.bf16 %v2866_v19  ;;  %v2873_v34 = vunpack.i.h.bf16 %v2871_v16  ;;  %v2872_v35 = vunpack.i.l.bf16 %v2871_v16  ;;  %v2901_v54 = vpop.permute.xlu2 %2900 }
  0xec   : > { %v2902_v58 = vunpack.i.l.bf16 %v2901_v54  ;;  %v2903_v0 = vunpack.i.h.bf16 %v2901_v54 }
  0xed   : > { %v1876_v31 = vsel %vm1873_vm8, %v2867_v25, %v2868_v24  ;;  %v1877_v32 = vsel %vm1873_vm8, %v2868_v24, %v2877_v26  ;;  %v1875_v38 = vsel %vm1873_vm8, %v2873_v34, %v2867_v25  ;;  %v1874_v39 = vsel %vm1873_vm8, %v2872_v35, %v2873_v34 }
  0xf0   : > { %2640 = vmatmul.msk.f32.vlgmr.msrb.gmra.mxu0 %vm468_vm2, %v2626_v50  ;;  %2641 = vmatmul.msk.f32.vlgmr.msrb.gmra.mxu1 %vm468_vm2, %v2626_v50 }
  0xf1   : > { %1572 = vmatpush.msrb.mxu0 %v1462_v6  ;;  %1592 = vmatpush.msrb.mxu1 %v1463_v7 }
  0xf2   : > { %2647 = vmatmul.msk.f32.vlgmr.msra.gmra.mxu2 %vm468_vm2, %v2644_v8  ;;  %2648 = vmatmul.msk.f32.vlgmr.msra.gmra.mxu3 %vm468_vm2, %v2644_v8  ;;  %v1872_v30 = vpop.permute.xlu1 %1871  ;;  %v2881_v33 = vpop.permute.xlu0 %2880 }
  0xf3   : > { %1750 = vmatpush.msra.mxu2 %v1678_v10  ;;  %1770 = vmatpush.msra.mxu3 %v1679_v11  ;;  %v2882_v37 = vunpack.i.l.bf16 %v2881_v33  ;;  %v2883_v44 = vunpack.i.h.bf16 %v2881_v33 }
  0xf5   : > { %v1880_v41 = vsel %vm1873_vm8, %v2878_v36, %v2882_v37  ;;  %v1881_v42 = vsel %vm1873_vm8, %v2882_v37, %v1872_v30  ;;  %v1878_v49 = vsel %vm1873_vm8, %v2877_v26, %v2883_v44  ;;  %v1879_v50 = vsel %vm1873_vm8, %v2883_v44, %v2878_v36 }
  0xf8   : > { %2645 = vmatmul.msk.f32.vlgmr.msra.gmra.mxu0 %vm468_vm2, %v2644_v8  ;;  %2646 = vmatmul.msk.f32.vlgmr.msra.gmra.mxu1 %vm468_vm2, %v2644_v8 }
  0xf9   : > { %1730 = vmatpush.msra.mxu1 %v1677_v17  ;;  %1710 = vmatpush.msra.mxu0 %v1676_v18 }
  0xfa   : > { %2651 = vmatmul.msk.f32.vlgmr.msrb.gmra.mxu2 %vm468_vm2, %v2644_v8  ;;  %2652 = vmatmul.msk.f32.vlgmr.msrb.gmra.mxu3 %vm468_vm2, %v2644_v8  ;;  %v2896_v43 = vpop.permute.xlu1 %2895  ;;  %v2891_v45 = vpop.permute.xlu0 %2890 }
  0xfb   : > { %1830 = vmatpush.msrb.mxu2 %v1682_v20  ;;  %1850 = vmatpush.msrb.mxu3 %v1683_v21  ;;  %v2897_v48 = vunpack.i.l.bf16 %v2896_v43  ;;  %v2893_v55 = vunpack.i.h.bf16 %v2891_v45  ;;  %v2892_v56 = vunpack.i.l.bf16 %v2891_v45  ;;  %v2898_v57 = vunpack.i.h.bf16 %v2896_v43 }
  0xfd   : > { %v2077_v53 = vsel %vm2073_vm9, %v2888_v46, %v2897_v48  ;;  %v2075_v60 = vsel %vm2073_vm9, %v2893_v55, %v2887_v47  ;;  %v2074_v61 = vsel %vm2073_vm9, %v2892_v56, %v2893_v55  ;;  %v2080_v62 = vsel %vm2073_vm9, %v2898_v57, %v2902_v58 }
  0xfe   : > { %v2078_v3 = vsel %vm2073_vm9, %v2897_v48, %v2903_v0  ;;  %v2079_v4 = vsel %vm2073_vm9, %v2903_v0, %v2898_v57 }
 0x100   : > { %2649 = vmatmul.msk.f32.vlgmr.msrb.gmra.mxu0 %vm468_vm2, %v2644_v8  ;;  %2650 = vmatmul.msk.f32.vlgmr.msrb.gmra.mxu1 %vm468_vm2, %v2644_v8 }
 0x101   : > { %1790 = vmatpush.msrb.mxu0 %v1680_v27  ;;  %1810 = vmatpush.msrb.mxu1 %v1681_v28 }
 0x102   : > { %2657 = vmatmul.msk.f32.vlgmr.msra.gmra.mxu2 %vm468_vm2, %v2654_v29  ;;  %2658 = vmatmul.msk.f32.vlgmr.msra.gmra.mxu3 %vm468_vm2, %v2654_v29  ;;  %v2072_v59 = vpop.permute.xlu0 %2071 }
 0x103   : > { %1948 = vmatpush.msra.mxu2 %v1876_v31  ;;  %1968 = vmatpush.msra.mxu3 %v1877_v32  ;;  %v2081_v63 = vsel %vm2073_vm9, %v2902_v58, %v2072_v59 }
 0x108   : > { %2655 = vmatmul.msk.f32.vlgmr.msra.gmra.mxu0 %vm468_vm2, %v2654_v29  ;;  %2656 = vmatmul.msk.f32.vlgmr.msra.gmra.mxu1 %vm468_vm2, %v2654_v29 }
 0x109   : > { %1928 = vmatpush.msra.mxu1 %v1875_v38  ;;  %1908 = vmatpush.msra.mxu0 %v1874_v39 }
 0x10a   : > { %2661 = vmatmul.msk.f32.vlgmr.msrb.gmra.mxu2 %vm468_vm2, %v2654_v29  ;;  %2662 = vmatmul.msk.f32.vlgmr.msrb.gmra.mxu3 %vm468_vm2, %v2654_v29 }
 0x10b   : > { %2028 = vmatpush.msrb.mxu2 %v1880_v41  ;;  %2048 = vmatpush.msrb.mxu3 %v1881_v42 }
 0x110   : > { %2659 = vmatmul.msk.f32.vlgmr.msrb.gmra.mxu0 %vm468_vm2, %v2654_v29  ;;  %2660 = vmatmul.msk.f32.vlgmr.msrb.gmra.mxu1 %vm468_vm2, %v2654_v29 }
 0x111   : > { %1988 = vmatpush.msrb.mxu0 %v1878_v49  ;;  %2008 = vmatpush.msrb.mxu1 %v1879_v50 }
 0x112   : > { %2665 = vmatmul.msk.f32.vlgmr.msra.gmra.mxu2 %vm468_vm2, %v2653_v51  ;;  %2666 = vmatmul.msk.f32.vlgmr.msra.gmra.mxu3 %vm468_vm2, %v2653_v51 }
 0x113   : > { %2148 = vmatpush.msra.mxu2 %v2076_v52  ;;  %2168 = vmatpush.msra.mxu3 %v2077_v53 }
 0x118   : > { %2663 = vmatmul.msk.f32.vlgmr.msra.gmra.mxu0 %vm468_vm2, %v2653_v51  ;;  %2664 = vmatmul.msk.f32.vlgmr.msra.gmra.mxu1 %vm468_vm2, %v2653_v51 }
 0x119   : > { %2128 = vmatpush.msra.mxu1 %v2075_v60  ;;  %2108 = vmatpush.msra.mxu0 %v2074_v61 }
 0x11a   : > { %2669 = vmatmul.msk.f32.vlgmr.msrb.gmra.mxu2 %vm468_vm2, %v2653_v51  ;;  %2670 = vmatmul.msk.f32.vlgmr.msrb.gmra.mxu3 %vm468_vm2, %v2653_v51 }
 0x11b   : > { %2228 = vmatpush.msrb.mxu2 %v2080_v62  ;;  %2248 = vmatpush.msrb.mxu3 %v2081_v63  ;;  %v1003_v62 = vld [vmem:[%s3379_s5] ss:$2 sm:$0xff] }
 0x11c   : > { %v1007_v63 = vperm.slane %v1003_v62, 2  ;;  %v1008_v0 = vperm.slane %v1003_v62, 3  ;;  %v1005_v1 = vperm.slane %v1003_v62, 0  ;;  %v1006_v2 = vperm.slane %v1003_v62, 1 }
 0x120   : > { %2667 = vmatmul.msk.f32.vlgmr.msrb.gmra.mxu0 %vm468_vm2, %v2653_v51  ;;  %2668 = vmatmul.msk.f32.vlgmr.msrb.gmra.mxu1 %vm468_vm2, %v2653_v51 }
 0x121   : > { %2188 = vmatpush.msrb.mxu0 %v2078_v3  ;;  %2208 = vmatpush.msrb.mxu1 %v2079_v4 }
 0x122   : > { %2674 = vmatmul.msk.f32.vlgmr.msra.gmra.mxu2 %vm468_vm2, %v2671_v5  ;;  %2675 = vmatmul.msk.f32.vlgmr.msra.gmra.mxu3 %vm468_vm2, %v2671_v5  ;;  %v529_v6 = vpop.f32.mrf.mxu2  ;;  %v549_v7 = vpop.f32.mrf.mxu3 }
 0x125   : > { %v489_v8 = vpop.f32.mrf.mxu0  ;;  %v509_v9 = vpop.f32.mrf.mxu1 }
 0x128   : > { %2672 = vmatmul.msk.f32.vlgmr.msra.gmra.mxu0 %vm468_vm2, %v2671_v5  ;;  %2673 = vmatmul.msk.f32.vlgmr.msra.gmra.mxu1 %vm468_vm2, %v2671_v5 }
 0x12a   : > { %2678 = vmatmul.msk.f32.vlgmr.msrb.gmra.mxu2 %vm468_vm2, %v2671_v5  ;;  %2679 = vmatmul.msk.f32.vlgmr.msrb.gmra.mxu3 %vm468_vm2, %v2671_v5 }
 0x12d   : > { %v609_v10 = vpop.f32.mrf.mxu2  ;;  %v629_v11 = vpop.f32.mrf.mxu3 }
 0x12e   : > { %v569_v12 = vpop.f32.mrf.mxu0  ;;  %v589_v13 = vpop.f32.mrf.mxu1 }
 0x130   : > { %2676 = vmatmul.msk.f32.vlgmr.msrb.gmra.mxu0 %vm468_vm2, %v2671_v5  ;;  %2677 = vmatmul.msk.f32.vlgmr.msrb.gmra.mxu1 %vm468_vm2, %v2671_v5 }
 0x135   : > { %v692_v14 = vpop.f32.mrf.mxu2  ;;  %v712_v15 = vpop.f32.mrf.mxu3 }
 0x136   : > { %v693_v16 = vadd.f32 %v692_v14, %v529_v6  ;;  %v713_v17 = vadd.f32 %v712_v15, %v549_v7  ;;  %v652_v18 = vpop.f32.mrf.mxu0  ;;  %v672_v19 = vpop.f32.mrf.mxu1 }
 0x137   : > { %v653_v20 = vadd.f32 %v652_v18, %v489_v8  ;;  %v673_v21 = vadd.f32 %v672_v19, %v509_v9 }
 0x13d   : > { %v772_v22 = vpop.f32.mrf.mxu2  ;;  %v792_v23 = vpop.f32.mrf.mxu3 }
 0x13e   : > { %v773_v24 = vadd.f32 %v772_v22, %v609_v10  ;;  %v793_v25 = vadd.f32 %v792_v23, %v629_v11  ;;  %v732_v26 = vpop.f32.mrf.mxu0  ;;  %v752_v27 = vpop.f32.mrf.mxu1  ;;  %v1011_v23 = vperm.slane %v1003_v62, 6 }
 0x13f   : > { %v733_v28 = vadd.f32 %v732_v26, %v569_v12  ;;  %v753_v29 = vadd.f32 %v752_v27, %v589_v13  ;;  %v1010_v26 = vperm.slane %v1003_v62, 5 }
 0x145   : > { %v892_v30 = vpop.f32.mrf.mxu2  ;;  %v912_v31 = vpop.f32.mrf.mxu3 }
 0x146   : > { %v997_v32 = vadd.f32 %v892_v30, %v693_v16  ;;  %v998_v33 = vadd.f32 %v912_v31, %v713_v17  ;;  %v852_v34 = vpop.f32.mrf.mxu0  ;;  %v872_v35 = vpop.f32.mrf.mxu1 }
 0x147   : > { %v995_v36 = vadd.f32 %v852_v34, %v653_v20  ;;  %v996_v37 = vadd.f32 %v872_v35, %v673_v21 }
 0x148   : > { %v1023_v9 = vmul.f32 %v1007_v63, %v997_v32  ;;  %v1024_v10 = vmul.f32 %v1008_v0, %v998_v33  ;;  %v2680_v63 = vld [vmem:[%s3379_s5 + $0x1] ss:$2 sm:$0xff] }
 0x149   : > { %v1021_v15 = vmul.f32 %v1005_v1, %v995_v36  ;;  %v1022_v16 = vmul.f32 %v1006_v2, %v996_v37  ;;  %v2266_v2 = vperm.slane %v2680_v63, 2 }
 0x14d   : > { %v972_v38 = vpop.f32.mrf.mxu2  ;;  %v992_v39 = vpop.f32.mrf.mxu3 }
 0x14e   : > { %v1001_v40 = vadd.f32 %v972_v38, %v773_v24  ;;  %v1002_v41 = vadd.f32 %v992_v39, %v793_v25  ;;  %v932_v42 = vpop.f32.mrf.mxu0  ;;  %v952_v43 = vpop.f32.mrf.mxu1  ;;  %v1012_v24 = vperm.slane %v1003_v62, 7  ;;  %v1009_v25 = vperm.slane %v1003_v62, 4 }
 0x14f   : > { %v999_v44 = vadd.f32 %v932_v42, %v733_v28  ;;  %v1000_v45 = vadd.f32 %v952_v43, %v753_v29 }
 0x150   : > { %v1027_v33 = vmul.f32 %v1011_v23, %v1001_v40  ;;  %v1028_v34 = vmul.f32 %v1012_v24, %v1002_v41 }
 0x151   : > { %v1025_v39 = vmul.f32 %v1009_v25, %v999_v44  ;;  %v1026_v42 = vmul.f32 %v1010_v26, %v1000_v45 }
 0x155   : > { %v1136_v46 = vpop.f32.mrf.mxu2  ;;  %v1156_v47 = vpop.f32.mrf.mxu3 }
 0x156   : > { %v1096_v48 = vpop.f32.mrf.mxu0  ;;  %v1116_v49 = vpop.f32.mrf.mxu1 }
 0x158   : > { %v2300_v24 = vpop.permute.xlu1 %2299 }
 0x15d   : > { %v1216_v50 = vpop.f32.mrf.mxu2  ;;  %v1236_v51 = vpop.f32.mrf.mxu3 }
 0x15e   : > { %v1176_v52 = vpop.f32.mrf.mxu0  ;;  %v1196_v53 = vpop.f32.mrf.mxu1 }
 0x165   : > { %v1334_v54 = vpop.f32.mrf.mxu2  ;;  %v1354_v55 = vpop.f32.mrf.mxu3 }
 0x166   : > { %v1294_v56 = vpop.f32.mrf.mxu0  ;;  %v1314_v57 = vpop.f32.mrf.mxu1  ;;  %v1335_v3 = vadd.f32 %v1334_v54, %v1136_v46  ;;  %v1355_v4 = vadd.f32 %v1354_v55, %v1156_v47 }
 0x167   : > { %v1295_v5 = vadd.f32 %v1294_v56, %v1096_v48  ;;  %v1315_v6 = vadd.f32 %v1314_v57, %v1116_v49 }
 0x16d   : > { %v1414_v58 = vpop.f32.mrf.mxu2  ;;  %v1434_v59 = vpop.f32.mrf.mxu3 }
 0x16e   : > { %v1374_v60 = vpop.f32.mrf.mxu0  ;;  %v1394_v61 = vpop.f32.mrf.mxu1  ;;  %v1415_v27 = vadd.f32 %v1414_v58, %v1216_v50  ;;  %v1435_v28 = vadd.f32 %v1434_v59, %v1236_v51 }
 0x16f   : > { %v1375_v29 = vadd.f32 %v1374_v60, %v1176_v52  ;;  %v1395_v30 = vadd.f32 %v1394_v61, %v1196_v53 }
 0x175   : > { %v1534_v7 = vpop.f32.mrf.mxu2  ;;  %v1554_v8 = vpop.f32.mrf.mxu3 }
 0x176   : > { %v1639_v11 = vadd.f32 %v1534_v7, %v1335_v3  ;;  %v1640_v12 = vadd.f32 %v1554_v8, %v1355_v4  ;;  %v1494_v13 = vpop.f32.mrf.mxu0  ;;  %v1514_v14 = vpop.f32.mrf.mxu1  ;;  %v2267_v3 = vperm.slane %v2680_v63, 3  ;;  %v2264_v8 = vperm.slane %v2680_v63, 0 }
 0x177   : > { %v1637_v17 = vadd.f32 %v1494_v13, %v1295_v5  ;;  %v1638_v18 = vadd.f32 %v1514_v14, %v1315_v6 }
 0x178   : > { %v3292_v19 = vadd.f32 %v1639_v11, %v1023_v9  ;;  %v3294_v20 = vadd.f32 %v1640_v12, %v1024_v10  ;;  %v2265_v9 = vperm.slane %v2680_v63, 1 }
 0x179   : > { %v3296_v21 = vadd.f32 %v1637_v17, %v1021_v15  ;;  %v3298_v22 = vadd.f32 %v1638_v18, %v1022_v16 }
 0x17d   : > { %v1614_v31 = vpop.f32.mrf.mxu2  ;;  %v1634_v32 = vpop.f32.mrf.mxu3 }
 0x17e   : > { %v1643_v35 = vadd.f32 %v1614_v31, %v1415_v27  ;;  %v1644_v36 = vadd.f32 %v1634_v32, %v1435_v28  ;;  %v1574_v37 = vpop.f32.mrf.mxu0  ;;  %v1594_v38 = vpop.f32.mrf.mxu1  ;;  %v2270_v27 = vperm.slane %v2680_v63, 6  ;;  %v2271_v28 = vperm.slane %v2680_v63, 7 }
 0x17f   : > { %v1641_v43 = vadd.f32 %v1574_v37, %v1375_v29  ;;  %v1642_v46 = vadd.f32 %v1594_v38, %v1395_v30  ;;  %v2268_v31 = vperm.slane %v2680_v63, 4  ;;  %v2269_v32 = vperm.slane %v2680_v63, 5 }
 0x180   : > { %v3300_v47 = vadd.f32 %v1643_v35, %v1027_v33  ;;  %v3302_v48 = vadd.f32 %v1644_v36, %v1028_v34 }
 0x181   : > { %v3304_v49 = vadd.f32 %v1641_v43, %v1025_v39  ;;  %v3306_v50 = vadd.f32 %v1642_v46, %v1026_v42 }
 0x185   : > { %v1752_v51 = vpop.f32.mrf.mxu2  ;;  %v1772_v52 = vpop.f32.mrf.mxu3 }
 0x186   : > { %v1712_v40 = vpop.f32.mrf.mxu0  ;;  %v1732_v41 = vpop.f32.mrf.mxu1 }
 0x18d   : > { %v1832_v53 = vpop.f32.mrf.mxu2  ;;  %v1852_v54 = vpop.f32.mrf.mxu3 }
 0x18e   : > { %v1792_v55 = vpop.f32.mrf.mxu0  ;;  %v1812_v56 = vpop.f32.mrf.mxu1 }
 0x195   : > { %v1950_v44 = vpop.f32.mrf.mxu2  ;;  %v1970_v45 = vpop.f32.mrf.mxu3 }
 0x196   : > { %v1910_v57 = vpop.f32.mrf.mxu0  ;;  %v1930_v58 = vpop.f32.mrf.mxu1  ;;  %v1951_v0 = vadd.f32 %v1950_v44, %v1752_v51  ;;  %v1971_v1 = vadd.f32 %v1970_v45, %v1772_v52 }
 0x197   : > { %v1911_v4 = vadd.f32 %v1910_v57, %v1712_v40  ;;  %v1931_v5 = vadd.f32 %v1930_v58, %v1732_v41 }
 0x19d   : > { %v2030_v59 = vpop.f32.mrf.mxu2  ;;  %v2050_v60 = vpop.f32.mrf.mxu3 }
 0x19e   : > { %v1990_v61 = vpop.f32.mrf.mxu0  ;;  %v2010_v62 = vpop.f32.mrf.mxu1  ;;  %v2031_v33 = vadd.f32 %v2030_v59, %v1832_v53  ;;  %v2051_v34 = vadd.f32 %v2050_v60, %v1852_v54 }
 0x19f   : > { %v1991_v37 = vadd.f32 %v1990_v61, %v1792_v55  ;;  %v2011_v38 = vadd.f32 %v2010_v62, %v1812_v56 }
 0x1a5   : > { %v2150_v6 = vpop.f32.mrf.mxu2  ;;  %v2170_v7 = vpop.f32.mrf.mxu3 }
 0x1a6   : > { %v2255_v10 = vadd.f32 %v2150_v6, %v1951_v0  ;;  %v2256_v11 = vadd.f32 %v2170_v7, %v1971_v1  ;;  %v2110_v12 = vpop.f32.mrf.mxu0  ;;  %v2130_v13 = vpop.f32.mrf.mxu1 }
 0x1a7   : > { %v2253_v14 = vadd.f32 %v2110_v12, %v1911_v4  ;;  %v2254_v15 = vadd.f32 %v2130_v13, %v1931_v5 }
 0x1a8   : > { %v2282_v16 = vmul.f32 %v2266_v2, %v2255_v10  ;;  %v2283_v17 = vmul.f32 %v2267_v3, %v2256_v11 }
 0x1a9   : > { %v2280_v18 = vmul.f32 %v2264_v8, %v2253_v14  ;;  %v2281_v23 = vmul.f32 %v2265_v9, %v2254_v15 }
 0x1aa   : > { %v2290_v25 = vadd.f32 %v2282_v16, %v3292_v19  ;;  %v2291_v26 = vadd.f32 %v2283_v17, %v3294_v20 }
 0x1ab   : > { %v2288_v29 = vadd.f32 %v2280_v18, %v3296_v21  ;;  %v2289_v30 = vadd.f32 %v2281_v23, %v3298_v22 }
 0x1ac   : > { %v2304_v35 = vadd.f32 %v2300_v24, %v2290_v25  ;;  %v2305_v36 = vadd.f32 %v2300_v24, %v2291_v26 }
 0x1ad   : > { %v2302_v39 = vadd.f32 %v2300_v24, %v2288_v29  ;;  %v2303_v42 = vadd.f32 %v2300_v24, %v2289_v30  ;;  %v2230_v19 = vpop.f32.mrf.mxu2  ;;  %v2250_v43 = vpop.f32.mrf.mxu3  ;;  %v2342_v29 = vld [vmem:[#allocation3] sm:$0xff] }
 0x1ae   : > { %v2259_v20 = vadd.f32 %v2230_v19, %v2031_v33  ;;  %v2260_v46 = vadd.f32 %v2250_v43, %v2051_v34  ;;  %v2190_v51 = vpop.f32.mrf.mxu0  ;;  %v2210_v52 = vpop.f32.mrf.mxu1  ;;  %v2312_v40 = vmax.f32 %v2304_v35, 0.0  ;;  %v2313_v21 = vmax.f32 %v2305_v36, 0.0 }
 0x1af   : > { %v2310_v41 = vmax.f32 %v2302_v39, 0.0  ;;  %v2311_v22 = vmax.f32 %v2303_v42, 0.0  ;;  %v2257_v44 = vadd.f32 %v2190_v51, %v1991_v37  ;;  %v2258_v45 = vadd.f32 %v2210_v52, %v2011_v38 }
 0x1b0   : > { %v2286_v53 = vmul.f32 %v2270_v27, %v2259_v20  ;;  %v2287_v54 = vmul.f32 %v2271_v28, %v2260_v46  ;;  %2323 = vst [vmem:[%s3316_s15 + $0x10] sm:$0xff] %v2312_v40  ;;  %v2345_v3 = vmul.f32 %v2312_v40, %v2312_v40  ;;  %v2329_v27 = vld [vmem:[#allocation2] sm:$0xff] }
 0x1b1   : > { %2321 = vst [vmem:[%s3316_s15] sm:$0xff] %v2310_v41  ;;  %v2284_v55 = vmul.f32 %v2268_v31, %v2257_v44  ;;  %v2285_v56 = vmul.f32 %v2269_v32, %v2258_v45  ;;  %v2330_v57 = vadd.f32 %v2311_v22, %v2310_v41  ;;  %v2343_v58 = vmul.f32 %v2310_v41, %v2310_v41 }
 0x1b2   : > { %2322 = vst [vmem:[%s3316_s15 + $0x8] sm:$0xff] %v2311_v22  ;;  %v2294_v59 = vadd.f32 %v2286_v53, %v3300_v47  ;;  %v2295_v60 = vadd.f32 %v2287_v54, %v3302_v48  ;;  %v2344_v61 = vmul.f32 %v2311_v22, %v2311_v22  ;;  %v2346_v48 = vmul.f32 %v2313_v21, %v2313_v21 }
 0x1b3   : > { %v2292_v62 = vadd.f32 %v2284_v55, %v3304_v49  ;;  %v2293_v63 = vadd.f32 %v2285_v56, %v3306_v50  ;;  %2324 = vst [vmem:[%s3316_s15 + $0x18] sm:$0xff] %v2313_v21  ;;  %v2331_v0 = vadd.f32 %v2330_v57, %v2312_v40 }
 0x1b4   : > { %v2308_v1 = vadd.f32 %v2300_v24, %v2294_v59  ;;  %v2309_v2 = vadd.f32 %v2300_v24, %v2295_v60  ;;  %v2351_v4 = vadd.f32 %v2344_v61, %v2343_v58 }
 0x1b5   : > { %v2306_v5 = vadd.f32 %v2300_v24, %v2292_v62  ;;  %v2307_v6 = vadd.f32 %v2300_v24, %v2293_v63  ;;  %v2332_v47 = vadd.f32 %v2331_v0, %v2313_v21 }
 0x1b6   : > { %v2316_v7 = vmax.f32 %v2308_v1, 0.0  ;;  %v2352_v8 = vadd.f32 %v2351_v4, %v2345_v3  ;;  %v2317_v10 = vmax.f32 %v2309_v2, 0.0 }
 0x1b7   : > { %v2314_v9 = vmax.f32 %v2306_v5, 0.0  ;;  %v2315_v49 = vmax.f32 %v2307_v6, 0.0 }
 0x1b8   : > { %2327 = vst [vmem:[%s3316_s15 + $0x30] sm:$0xff] %v2316_v7  ;;  %v2353_v50 = vadd.f32 %v2352_v8, %v2346_v48  ;;  %v2349_v17 = vmul.f32 %v2316_v7, %v2316_v7  ;;  %v2350_v24 = vmul.f32 %v2317_v10, %v2317_v10 }
 0x1b9   : > { %2325 = vst [vmem:[%s3316_s15 + $0x20] sm:$0xff] %v2314_v9  ;;  %v2333_v11 = vadd.f32 %v2332_v47, %v2314_v9  ;;  %v2347_v12 = vmul.f32 %v2314_v9, %v2314_v9  ;;  %v2348_v14 = vmul.f32 %v2315_v49, %v2315_v49 }
 0x1ba   : > { %2326 = vst [vmem:[%s3316_s15 + $0x28] sm:$0xff] %v2315_v49 }
 0x1bb   : > { %2328 = vst [vmem:[%s3316_s15 + $0x38] sm:$0xff] %v2317_v10  ;;  %v2334_v13 = vadd.f32 %v2333_v11, %v2315_v49  ;;  %v2354_v15 = vadd.f32 %v2353_v50, %v2347_v12 }
 0x1bd   : > { %v2335_v16 = vadd.f32 %v2334_v13, %v2316_v7  ;;  %v2355_v18 = vadd.f32 %v2354_v15, %v2348_v14 }
 0x1bf   : > { %v2336_v23 = vadd.f32 %v2335_v16, %v2317_v10  ;;  %v2356_v25 = vadd.f32 %v2355_v18, %v2349_v17 }
 0x1c1   : > { %2337 = vadd.xlane.f32.xlu2 %v2336_v23  ;;  %v2357_v26 = vadd.f32 %v2356_v25, %v2350_v24 }
 0x1c3   : > { %2358 = vadd.xlane.f32.xlu0 %v2357_v26 }
 0x234   : > { %v2338_v28 = vpop.xlane.xlu2 %2337 }
 0x235   : > { %v2339_v30 = vadd.f32 %v2338_v28, %v2329_v27 }
 0x236   : > { %v2359_v31 = vpop.xlane.xlu0 %2358 }
 0x237   : > { %2341 = vst.msk [vmem:[#allocation2] sm:$0xff] %vm2340_vm10, %v2339_v30  ;;  %v2360_v32 = vadd.f32 %v2359_v31, %v2342_v29 }
 0x239   : > { %2361 = vst.msk [vmem:[#allocation3] sm:$0xff] %vm2340_vm10, %v2360_v32 }
 0x23a PF: > { %p2683_p11 = scmp.ne.s32.totalorder %s2935_s28, 1 }
 0x23c   : > { %2365 = sbr.rel (%p2683_p11) target bundleno = 739 (0x2e3), region = 64 }
 0x241   : > { %v2377_v33 = vld [vmem:[#allocation2] sm:$0xff]  ;;  %v2379_v34 = vld [vmem:[#allocation3] sm:$0xff]  ;;  %v2959_v35 = vmov 0   ;;  %v2435_v61 = vld [vmem:[%s3049_s21 + $0x10] sm:$0xff] }
 0x242   : > { %2906 = vset.pattern.permute.xlu0 %v2959_v35  ;;  %v2378_v36 = vmul.f32 0.00048828125, %v2377_v33  ;;  %v2380_v37 = vmul.f32 0.00048828125, %v2379_v34  ;;  %v2394_v40 = vld [vmem:[%s3377_s3] sm:$0xff]  ;;  %v2434_v60 = vld [vmem:[%s3049_s21 + $0x8] sm:$0xff]  ;;  %v2436_v1 = vld [vmem:[%s3049_s21 + $0x18] sm:$0xff]  ;;  %v2441_v47 = vunpack.c.l.bf16 %v2435_v61  ;;  %v2442_v7 = vunpack.c.h.bf16 %v2435_v61 }
 0x243   : > { %v2396_v44 = vld [vmem:[%s3378_s4] sm:$0xff]  ;;  %v2439_v4 = vunpack.c.l.bf16 %v2434_v60  ;;  %v2440_v6 = vunpack.c.h.bf16 %v2434_v60  ;;  %v2443_v10 = vunpack.c.l.bf16 %v2436_v1  ;;  %v2444_v17 = vunpack.c.h.bf16 %v2436_v1 }
 0x244   : > { %v2381_v38 = vmul.f32 %v2378_v36, %v2378_v36  ;;  %v2445_v53 = vld [vmem:[%s3054_s24] sm:$0xff] }
 0x245   : > { %v2446_v54 = vunpack.c.l.bf16 %v2445_v53  ;;  %v2447_v55 = vunpack.c.h.bf16 %v2445_v53  ;;  %v2433_v59 = vld [vmem:[%s3049_s21] sm:$0xff]  ;;  %s2691_s21 = sshll.u32 %s2931_s27, 6 }
 0x246   : > { %v2382_v39 = vsub.f32 %v2380_v37, %v2381_v38  ;;  %v2437_v2 = vunpack.c.l.bf16 %v2433_v59  ;;  %v2438_v3 = vunpack.c.h.bf16 %v2433_v59  ;;  %s2368_s24 = scalar_lea.vmem [#allocation4], %s2691_s21 }
 0x247   : > { %v2450_v56 = vperm.slane %v2446_v54, 0  ;;  %v2451_v57 = vperm.slane %v2446_v54, 2  ;;  %v2452_v58 = vperm.slane %v2446_v54, 4  ;;  %v2453_v62 = vperm.slane %v2446_v54, 6  ;;  %v2369_v29 = vld [vmem:[%s2368_s24] sm:$0xff]  ;;  %v2370_v30 = vld [vmem:[%s2368_s24 + $0x8] sm:$0xff] }
 0x248   : > { %v2383_v42 = vadd.f32 0.8, %v2382_v39  ;;  %v2454_v63 = vperm.slane %v2447_v55, 0  ;;  %v2455_v0 = vperm.slane %v2447_v55, 2  ;;  %v2456_v5 = vperm.slane %v2447_v55, 4  ;;  %v2371_v31 = vld [vmem:[%s2368_s24 + $0x10] sm:$0xff] }
 0x249   : > { %v2457_v48 = vperm.slane %v2447_v55, 6  ;;  %v2466_v8 = vperm.slane %v2450_v56, 0  ;;  %v2467_v9 = vperm.slane %v2451_v57, 0  ;;  %v2468_v49 = vperm.slane %v2452_v58, 0  ;;  %v2372_v32 = vld [vmem:[%s2368_s24 + $0x18] sm:$0xff]  ;;  %v2373_v33 = vld [vmem:[%s2368_s24 + $0x20] sm:$0xff] }
 0x24a   : > { %2907 = vrsqrt.f32 %v2383_v42  ;;  %vm2390_vm11 = vweird.f32 %v2383_v42  ;;  %v2469_v50 = vperm.slane %v2453_v62, 0  ;;  %v2470_v11 = vperm.slane %v2454_v63, 0  ;;  %v2374_v34 = vld [vmem:[%s2368_s24 + $0x28] sm:$0xff]  ;;  %v2375_v39 = vld [vmem:[%s2368_s24 + $0x30] sm:$0xff] }
 0x24b   : > { %v2471_v12 = vperm.slane %v2455_v0, 0  ;;  %v2472_v13 = vperm.slane %v2456_v5, 0  ;;  %v2474_v14 = vmul.f32 %v2466_v8, %v2437_v2  ;;  %v2475_v15 = vmul.f32 %v2467_v9, %v2438_v3 }
 0x24c   : > { %v2476_v16 = vmul.f32 %v2468_v49, %v2439_v4  ;;  %v2473_v18 = vperm.slane %v2457_v48, 0  ;;  %v2477_v23 = vmul.f32 %v2469_v50, %v2440_v6  ;;  %v2478_v24 = vmul.f32 %v2470_v11, %v2441_v47 }
 0x24d   : > { %2482 = vst [vmem:[%s3062_s30 + $0x40] sm:$0xff] %v2474_v14  ;;  %v2479_v25 = vmul.f32 %v2471_v12, %v2442_v7  ;;  %v2480_v26 = vmul.f32 %v2472_v13, %v2443_v10 }
 0x24e   : > { %2483 = vst [vmem:[%s3062_s30 + $0x48] sm:$0xff] %v2475_v15  ;;  %v2481_v27 = vmul.f32 %v2473_v18, %v2444_v17 }
 0x24f   : > { %2484 = vst [vmem:[%s3062_s30 + $0x50] sm:$0xff] %v2476_v16 }
 0x250   : > { %v2908_v19 = vpop.eup %2907  ;;  %2485 = vst [vmem:[%s3062_s30 + $0x58] sm:$0xff] %v2477_v23 }
 0x251   : > { %v2385_v43 = vmul.f32 %v2908_v19, %v2383_v42  ;;  %vm2391_vm12 = vweird.f32 %v2908_v19  ;;  %2486 = vst [vmem:[%s3062_s30 + $0x60] sm:$0xff] %v2478_v24 }
 0x252   : > { %vm2392_vm13 = vmor %vm2390_vm11, %vm2391_vm12  ;;  %2487 = vst [vmem:[%s3062_s30 + $0x68] sm:$0xff] %v2479_v25 }
 0x253   : > { %v2386_v20 = vmul.f32 %v2908_v19, %v2385_v43  ;;  %2488 = vst [vmem:[%s3062_s30 + $0x70] sm:$0xff] %v2480_v26 }
 0x254   : > { %2489 = vst [vmem:[%s3062_s30 + $0x78] sm:$0xff] %v2481_v27 }
 0x255   : > { %v2387_v46 = vmul.f32 0.5, %v2386_v20 }
 0x257   : > { %v2388_v51 = vsub.f32 1.5, %v2387_v46 }
 0x259   : > { %v2389_v52 = vmul.f32 %v2908_v19, %v2388_v51 }
 0x25b   : > { %v2393_v21 = vsel %vm2392_vm13, %v2908_v19, %v2389_v52  ;;  %v2376_v19 = vld [vmem:[%s2368_s24 + $0x38] sm:$0xff] }
 0x25c   : > { %v2395_v41 = vmul.f32 %v2394_v40, %v2393_v21 }
 0x25e   : > { %2401 = vperm.xlu0 %2906, %v2395_v41   ;;  %v2397_v22 = vmul.f32 %v2395_v41, %v2378_v36 }
 0x260   : > { %v2398_v45 = vsub.f32 %v2396_v44, %v2397_v22 }
 0x266   : > { %2414 = vperm.xlu0 %2906, %v2398_v45  }
 0x2d0   : > { %v2402_v28 = vpop.permute.xlu0 %2401 }
 0x2d1   : > { %v2404_v35 = vmul.f32 %v2402_v28, %v2369_v29  ;;  %v2405_v36 = vmul.f32 %v2402_v28, %v2370_v30  ;;  %v2406_v37 = vmul.f32 %v2402_v28, %v2371_v31  ;;  %v2407_v42 = vmul.f32 %v2402_v28, %v2372_v32 }
 0x2d2   : > { %v2408_v43 = vmul.f32 %v2402_v28, %v2373_v33  ;;  %v2409_v52 = vmul.f32 %v2402_v28, %v2374_v34  ;;  %v2410_v21 = vmul.f32 %v2402_v28, %v2375_v39  ;;  %v2411_v22 = vmul.f32 %v2402_v28, %v2376_v19 }
 0x2d8   : > { %v2415_v38 = vpop.permute.xlu0 %2414 }
 0x2d9   : > { %v2417_v20 = vadd.f32 %v2415_v38, %v2404_v35  ;;  %v2418_v46 = vadd.f32 %v2415_v38, %v2405_v36  ;;  %v2419_v51 = vadd.f32 %v2415_v38, %v2406_v37  ;;  %v2420_v40 = vadd.f32 %v2415_v38, %v2407_v42 }
 0x2da   : > { %v2421_v41 = vadd.f32 %v2415_v38, %v2408_v43  ;;  %v2422_v44 = vadd.f32 %v2415_v38, %v2409_v52  ;;  %v2423_v45 = vadd.f32 %v2415_v38, %v2410_v21  ;;  %v2424_v53 = vadd.f32 %v2415_v38, %v2411_v22 }
 0x2db   : > { %2425 = vst [vmem:[%s3062_s30] sm:$0xff] %v2417_v20 }
 0x2dc   : > { %2426 = vst [vmem:[%s3062_s30 + $0x8] sm:$0xff] %v2418_v46 }
 0x2dd   : > { %2427 = vst [vmem:[%s3062_s30 + $0x10] sm:$0xff] %v2419_v51 }
 0x2de   : > { %2428 = vst [vmem:[%s3062_s30 + $0x18] sm:$0xff] %v2420_v40 }
 0x2df   : > { %2429 = vst [vmem:[%s3062_s30 + $0x20] sm:$0xff] %v2421_v41 }
 0x2e0   : > { %2430 = vst [vmem:[%s3062_s30 + $0x28] sm:$0xff] %v2422_v44 }
 0x2e1   : > { %2431 = vst [vmem:[%s3062_s30 + $0x30] sm:$0xff] %v2423_v45 }
 0x2e2   : > { %2432 = vst [vmem:[%s3062_s30 + $0x38] sm:$0xff] %v2424_v53 }
 0x2e3 PF: > { %s18_s9 = sadd.s32 1, %s2947_s9   ;;  %s3387_s28 = sld [smem:[#allocation5_spill]] }
 0x2e4   : > { %p15_p12 = scmp.ge.s32.totalorder %s18_s9, 6   ;;  %s3388_s19 = sld [smem:[#allocation6_spill]] }
 0x2e5   : > { %s3389_s30 = sld [smem:[#allocation7_spill]]  ;;  %s3390_s27 = smov %s2939_s29 }
 0x2e6   :  { %17 = sbr.rel (!%p15_p12) target bundleno = 3 (0x3), region = 111 }
 0x2ea   : > { %s3391_s29 = smov %s3388_s19 }

</bundles_post_ra>
